<compile_context>
chip_gen: v5e
topology: v5e:2x2
jax: 0.10.0
libtpu: 0.0.40
codegen_flags: <defaults>
</compile_context>

<pallas_src>
import functools

import jax
import jax.numpy as jnp
from jax.experimental import pallas as pl
from jax.experimental.pallas import tpu as pltpu


def _clusterator_kernel(data_ref, init_ref, mu_ref, rt_ref, *, temp, num_iter):
    """Fused soft k-means: num_iter mu updates + 1 epilogue step.

    Writes the final (post-update) mu and r^T = softmax(temp * mu_n @ data^T)
    of the epilogue's pre-update mu (exactly the PyTorch forward outputs).
    """
    data = data_ref[...]                                    # (n, d) f32
    # data = data / (||data||_2 + 1e-8)   (row-wise, matches torch semantics)
    dnorm = jnp.sqrt(jnp.sum(data * data, axis=1, keepdims=True))
    data = data * pl.reciprocal(dnorm + 1e-8, approx=False)

    def half_step(mu):
        """One step in the (K, .) layout; returns (r^T, cluster_mean, cluster_r)."""
        # mu_n = mu / ||mu|| (no epsilon, as in the reference); fold temp in so
        # the softmax logits come pre-scaled out of the matmul.
        mu_s = mu * (jax.lax.rsqrt(jnp.sum(mu * mu, axis=1, keepdims=True)) * temp)
        # logits^T = temp * (mu_n @ data^T): contract the feature dim -> (K, n).
        logits = jax.lax.dot_general(
            mu_s, data, (((1,), (1,)), ((), ())),
            preferred_element_type=jnp.float32)                          # (K, n)
        # Softmax over K (axis 0).  No max-subtraction: rows of data and mu_n
        # are unit-norm, so |logits| <= |temp| < 80 and exp() stays finite.
        e = jnp.exp(logits)
        r_t = e * pl.reciprocal(jnp.sum(e, axis=0, keepdims=True),
                                approx=False)                            # (K, n)
        # cluster_mean = r^T @ data (contract node dim); cluster_r = lane sum.
        cluster_mean = jax.lax.dot_general(
            r_t, data, (((1,), (0,)), ((), ())),
            preferred_element_type=jnp.float32)                          # (K, d)
        cluster_r = jnp.sum(r_t, axis=1, keepdims=True)                  # (K, 1)
        return r_t, cluster_mean, cluster_r

    def body(_, mu):
        _, cluster_mean, cluster_r = half_step(mu)
        # approx=True is safe here: it only scales each mu row by (1 + eps),
        # which the next step's normalization cancels exactly.
        return cluster_mean * pl.reciprocal(cluster_r, approx=True)

    # num_iter mu updates (first cluster() call of the PyTorch forward) ...
    mu = jax.lax.fori_loop(0, num_iter, body, init_ref[...], unroll=True)

    # ... plus one epilogue step (the second cluster() call): emit r from the
    # pre-update mu and the post-update mu.  Exact reciprocals on the outputs.
    r_t, cluster_mean, cluster_r = half_step(mu)
    rt_ref[...] = r_t
    mu_ref[...] = cluster_mean * pl.reciprocal(cluster_r, approx=False)


def clusterator_forward(embeds, init, cluster_temp, num_iter=10):
    """Mirrors Clusterator.forward (two cluster() calls) as one fused kernel."""
    n, d = embeds.shape
    k = init.shape[0]
    temp = float(cluster_temp)
    # Max-subtraction-free softmax needs |logits| <= |temp| well below exp's
    # f32 overflow (~88); gate statically since temp is a compile-time const.
    if not abs(temp) < 80.0:
        raise ValueError("clusterator_forward requires |cluster_temp| < 80.")

    kernel = functools.partial(_clusterator_kernel, temp=temp,
                               num_iter=int(num_iter))
    mu, r_t = pl.pallas_call(
        kernel,
        out_shape=(
            jax.ShapeDtypeStruct((k, d), jnp.float32),   # mu
            jax.ShapeDtypeStruct((k, n), jnp.float32),   # r^T (lane-denser store)
        ),
        in_specs=[
            pl.BlockSpec(memory_space=pltpu.MemorySpace.VMEM),   # embeds
            pl.BlockSpec(memory_space=pltpu.MemorySpace.VMEM),   # init
        ],
        out_specs=(
            pl.BlockSpec(memory_space=pltpu.MemorySpace.VMEM),
            pl.BlockSpec(memory_space=pltpu.MemorySpace.VMEM),
        ),
    )(embeds.astype(jnp.float32), init.astype(jnp.float32))
    # Single wrapper-side transpose back to the module's (n, K) layout.
    return mu, r_t.T


# -------- pure-JAX reference (two-call structure, for correctness only) -----
def _cluster_ref(data, init, cluster_temp, num_iter):
    data = data / (jnp.linalg.norm(data, axis=1) + 1e-8)[:, None]
    mu = init
    dist = None
    for _ in range(num_iter):
        mu = mu / jnp.linalg.norm(mu, axis=1)[:, None]
        dist = data @ mu.T
        r = jax.nn.softmax(cluster_temp * dist, axis=1)
        cluster_r = r.sum(axis=0)
        cluster_mean = r.T @ data
        mu = cluster_mean / cluster_r[:, None]
    r = jax.nn.softmax(cluster_temp * dist, axis=1)
    return mu, r


def _forward_ref(embeds, init, cluster_temp, num_iter=10):
    mu_init, _ = _cluster_ref(embeds, init, cluster_temp, num_iter)
    mu, r = _cluster_ref(embeds, mu_init, cluster_temp, 1)
    return mu, r


if __name__ == "__main__":
    # Small shapes consistent with the module: n nodes, nout features, K clusters.
    n, nout, K = 64, 32, 16
    cluster_temp = 30.0
    num_iter = 10

    key = jax.random.PRNGKey(0)
    k_emb, k_init = jax.random.split(key)
    embeds = jax.random.normal(k_emb, (n, nout), dtype=jnp.float32)
    # torch.rand(K, nout) -> uniform [0, 1), deterministic in-script init.
    init = jax.random.uniform(k_init, (K, nout), dtype=jnp.float32)

    mu, r = clusterator_forward(embeds, init, cluster_temp, num_iter)
    mu = jax.block_until_ready(mu)
    r = jax.block_until_ready(r)

    mu_ref, r_ref = _forward_ref(embeds, init, cluster_temp, num_iter)
    assert mu.shape == (K, nout) and r.shape == (n, K)
    # Tolerance covers summation-order differences of the transposed layout
    # over 11 chained, temp-amplified iterations.
    assert jnp.allclose(mu, mu_ref, atol=1e-3, rtol=1e-3)
    assert jnp.allclose(r, r_ref, atol=1e-3, rtol=1e-3)

    print("KERNEL_OK")
</pallas_src>

<mosaic_0001>
module attributes {stable_mosaic.version = 11 : i64} {
  func.func @_clusterator_kernel(%arg0: memref<64x32xf32, #tpu.memory_space<vmem>>, %arg1: memref<16x32xf32, #tpu.memory_space<vmem>>, %arg2: memref<16x32xf32, #tpu.memory_space<vmem>>, %arg3: memref<16x64xf32, #tpu.memory_space<vmem>>) attributes {dimension_semantics = [], scalar_prefetch = 0 : i64, scratch_operands = 0 : i64, tpu.core_type = #tpu.core_type<tc>} {
    %c0 = arith.constant 0 : index
    %c0_0 = arith.constant 0 : index
    %0 = vector.load %arg0[%c0, %c0_0] : memref<64x32xf32, #tpu.memory_space<vmem>>, vector<64x32xf32>
    %1 = arith.mulf %0, %0 : vector<64x32xf32>
    %cst = arith.constant dense<0.000000e+00> : vector<64xf32>
    %2 = vector.multi_reduction <add>, %1, %cst [1] : vector<64x32xf32> to vector<64xf32>
    %3 = vector.shape_cast %2 : vector<64xf32> to vector<64x1xf32>
    %4 = math.sqrt %3 : vector<64x1xf32>
    %cst_1 = arith.constant 9.99999993E-9 : f32
    %5 = vector.broadcast %cst_1 : f32 to vector<64x1xf32>
    %6 = arith.addf %4, %5 : vector<64x1xf32>
    %7 = tpu.reciprocal %6 : vector<64x1xf32> -> vector<64x1xf32>
    %8 = vector.broadcast %7 : vector<64x1xf32> to vector<64x32xf32>
    %9 = arith.mulf %0, %8 : vector<64x32xf32>
    %c0_2 = arith.constant 0 : index
    %c0_3 = arith.constant 0 : index
    %10 = vector.load %arg1[%c0_2, %c0_3] : memref<16x32xf32, #tpu.memory_space<vmem>>, vector<16x32xf32>
    %c0_i32 = arith.constant 0 : i32
    %11 = arith.mulf %10, %10 : vector<16x32xf32>
    %cst_4 = arith.constant dense<0.000000e+00> : vector<16xf32>
    %12 = vector.multi_reduction <add>, %11, %cst_4 [1] : vector<16x32xf32> to vector<16xf32>
    %13 = vector.shape_cast %12 : vector<16xf32> to vector<16x1xf32>
    %14 = math.rsqrt %13 : vector<16x1xf32>
    %cst_5 = arith.constant 3.000000e+01 : f32
    %15 = vector.broadcast %cst_5 : f32 to vector<16x1xf32>
    %16 = arith.mulf %14, %15 : vector<16x1xf32>
    %17 = vector.broadcast %16 : vector<16x1xf32> to vector<16x32xf32>
    %18 = arith.mulf %10, %17 : vector<16x32xf32>
    %cst_6 = arith.constant dense<0.000000e+00> : vector<16x64xf32>
    %19 = tpu.matmul %18, %9, %cst_6 {dimension_numbers = #tpu.dot_dimension_numbers<[1], [1], [0], [0], [0, 0, 1, 0], [], []>} : vector<16x32xf32>, vector<64x32xf32>, vector<16x64xf32> -> vector<16x64xf32>
    %20 = math.exp %19 : vector<16x64xf32>
    %cst_7 = arith.constant dense<0.000000e+00> : vector<64xf32>
    %21 = vector.multi_reduction <add>, %20, %cst_7 [0] : vector<16x64xf32> to vector<64xf32>
    %22 = vector.shape_cast %21 : vector<64xf32> to vector<1x64xf32>
    %23 = tpu.reciprocal %22 : vector<1x64xf32> -> vector<1x64xf32>
    %24 = vector.broadcast %23 : vector<1x64xf32> to vector<16x64xf32>
    %25 = arith.mulf %20, %24 : vector<16x64xf32>
    %cst_8 = arith.constant dense<0.000000e+00> : vector<16x32xf32>
    %26 = tpu.matmul %25, %9, %cst_8 {dimension_numbers = #tpu.dot_dimension_numbers<[1], [0], [0], [1], [0, 0, 1, 1], [], []>} : vector<16x64xf32>, vector<64x32xf32>, vector<16x32xf32> -> vector<16x32xf32>
    %cst_9 = arith.constant dense<0.000000e+00> : vector<16xf32>
    %27 = vector.multi_reduction <add>, %25, %cst_9 [1] : vector<16x64xf32> to vector<16xf32>
    %28 = vector.shape_cast %27 : vector<16xf32> to vector<16x1xf32>
    %29 = tpu.reciprocal %28 {approx = true} : vector<16x1xf32> -> vector<16x1xf32>
    %30 = vector.broadcast %29 : vector<16x1xf32> to vector<16x32xf32>
    %31 = arith.mulf %26, %30 : vector<16x32xf32>
    %c1_i32 = arith.constant 1 : i32
    %32 = arith.mulf %31, %31 : vector<16x32xf32>
    %cst_10 = arith.constant dense<0.000000e+00> : vector<16xf32>
    %33 = vector.multi_reduction <add>, %32, %cst_10 [1] : vector<16x32xf32> to vector<16xf32>
    %34 = vector.shape_cast %33 : vector<16xf32> to vector<16x1xf32>
    %35 = math.rsqrt %34 : vector<16x1xf32>
    %cst_11 = arith.constant 3.000000e+01 : f32
    %36 = vector.broadcast %cst_11 : f32 to vector<16x1xf32>
    %37 = arith.mulf %35, %36 : vector<16x1xf32>
    %38 = vector.broadcast %37 : vector<16x1xf32> to vector<16x32xf32>
    %39 = arith.mulf %31, %38 : vector<16x32xf32>
    %cst_12 = arith.constant dense<0.000000e+00> : vector<16x64xf32>
    %40 = tpu.matmul %39, %9, %cst_12 {dimension_numbers = #tpu.dot_dimension_numbers<[1], [1], [0], [0], [0, 0, 1, 0], [], []>} : vector<16x32xf32>, vector<64x32xf32>, vector<16x64xf32> -> vector<16x64xf32>
    %41 = math.exp %40 : vector<16x64xf32>
    %cst_13 = arith.constant dense<0.000000e+00> : vector<64xf32>
    %42 = vector.multi_reduction <add>, %41, %cst_13 [0] : vector<16x64xf32> to vector<64xf32>
    %43 = vector.shape_cast %42 : vector<64xf32> to vector<1x64xf32>
    %44 = tpu.reciprocal %43 : vector<1x64xf32> -> vector<1x64xf32>
    %45 = vector.broadcast %44 : vector<1x64xf32> to vector<16x64xf32>
    %46 = arith.mulf %41, %45 : vector<16x64xf32>
    %cst_14 = arith.constant dense<0.000000e+00> : vector<16x32xf32>
    %47 = tpu.matmul %46, %9, %cst_14 {dimension_numbers = #tpu.dot_dimension_numbers<[1], [0], [0], [1], [0, 0, 1, 1], [], []>} : vector<16x64xf32>, vector<64x32xf32>, vector<16x32xf32> -> vector<16x32xf32>
    %cst_15 = arith.constant dense<0.000000e+00> : vector<16xf32>
    %48 = vector.multi_reduction <add>, %46, %cst_15 [1] : vector<16x64xf32> to vector<16xf32>
    %49 = vector.shape_cast %48 : vector<16xf32> to vector<16x1xf32>
    %50 = tpu.reciprocal %49 {approx = true} : vector<16x1xf32> -> vector<16x1xf32>
    %51 = vector.broadcast %50 : vector<16x1xf32> to vector<16x32xf32>
    %52 = arith.mulf %47, %51 : vector<16x32xf32>
    %c2_i32 = arith.constant 2 : i32
    %53 = arith.mulf %52, %52 : vector<16x32xf32>
    %cst_16 = arith.constant dense<0.000000e+00> : vector<16xf32>
    %54 = vector.multi_reduction <add>, %53, %cst_16 [1] : vector<16x32xf32> to vector<16xf32>
    %55 = vector.shape_cast %54 : vector<16xf32> to vector<16x1xf32>
    %56 = math.rsqrt %55 : vector<16x1xf32>
    %cst_17 = arith.constant 3.000000e+01 : f32
    %57 = vector.broadcast %cst_17 : f32 to vector<16x1xf32>
    %58 = arith.mulf %56, %57 : vector<16x1xf32>
    %59 = vector.broadcast %58 : vector<16x1xf32> to vector<16x32xf32>
    %60 = arith.mulf %52, %59 : vector<16x32xf32>
    %cst_18 = arith.constant dense<0.000000e+00> : vector<16x64xf32>
    %61 = tpu.matmul %60, %9, %cst_18 {dimension_numbers = #tpu.dot_dimension_numbers<[1], [1], [0], [0], [0, 0, 1, 0], [], []>} : vector<16x32xf32>, vector<64x32xf32>, vector<16x64xf32> -> vector<16x64xf32>
    %62 = math.exp %61 : vector<16x64xf32>
    %cst_19 = arith.constant dense<0.000000e+00> : vector<64xf32>
    %63 = vector.multi_reduction <add>, %62, %cst_19 [0] : vector<16x64xf32> to vector<64xf32>
    %64 = vector.shape_cast %63 : vector<64xf32> to vector<1x64xf32>
    %65 = tpu.reciprocal %64 : vector<1x64xf32> -> vector<1x64xf32>
    %66 = vector.broadcast %65 : vector<1x64xf32> to vector<16x64xf32>
    %67 = arith.mulf %62, %66 : vector<16x64xf32>
    %cst_20 = arith.constant dense<0.000000e+00> : vector<16x32xf32>
    %68 = tpu.matmul %67, %9, %cst_20 {dimension_numbers = #tpu.dot_dimension_numbers<[1], [0], [0], [1], [0, 0, 1, 1], [], []>} : vector<16x64xf32>, vector<64x32xf32>, vector<16x32xf32> -> vector<16x32xf32>
    %cst_21 = arith.constant dense<0.000000e+00> : vector<16xf32>
    %69 = vector.multi_reduction <add>, %67, %cst_21 [1] : vector<16x64xf32> to vector<16xf32>
    %70 = vector.shape_cast %69 : vector<16xf32> to vector<16x1xf32>
    %71 = tpu.reciprocal %70 {approx = true} : vector<16x1xf32> -> vector<16x1xf32>
    %72 = vector.broadcast %71 : vector<16x1xf32> to vector<16x32xf32>
    %73 = arith.mulf %68, %72 : vector<16x32xf32>
    %c3_i32 = arith.constant 3 : i32
    %74 = arith.mulf %73, %73 : vector<16x32xf32>
    %cst_22 = arith.constant dense<0.000000e+00> : vector<16xf32>
    %75 = vector.multi_reduction <add>, %74, %cst_22 [1] : vector<16x32xf32> to vector<16xf32>
    %76 = vector.shape_cast %75 : vector<16xf32> to vector<16x1xf32>
    %77 = math.rsqrt %76 : vector<16x1xf32>
    %cst_23 = arith.constant 3.000000e+01 : f32
    %78 = vector.broadcast %cst_23 : f32 to vector<16x1xf32>
    %79 = arith.mulf %77, %78 : vector<16x1xf32>
    %80 = vector.broadcast %79 : vector<16x1xf32> to vector<16x32xf32>
    %81 = arith.mulf %73, %80 : vector<16x32xf32>
    %cst_24 = arith.constant dense<0.000000e+00> : vector<16x64xf32>
    %82 = tpu.matmul %81, %9, %cst_24 {dimension_numbers = #tpu.dot_dimension_numbers<[1], [1], [0], [0], [0, 0, 1, 0], [], []>} : vector<16x32xf32>, vector<64x32xf32>, vector<16x64xf32> -> vector<16x64xf32>
    %83 = math.exp %82 : vector<16x64xf32>
    %cst_25 = arith.constant dense<0.000000e+00> : vector<64xf32>
    %84 = vector.multi_reduction <add>, %83, %cst_25 [0] : vector<16x64xf32> to vector<64xf32>
    %85 = vector.shape_cast %84 : vector<64xf32> to vector<1x64xf32>
    %86 = tpu.reciprocal %85 : vector<1x64xf32> -> vector<1x64xf32>
    %87 = vector.broadcast %86 : vector<1x64xf32> to vector<16x64xf32>
    %88 = arith.mulf %83, %87 : vector<16x64xf32>
    %cst_26 = arith.constant dense<0.000000e+00> : vector<16x32xf32>
    %89 = tpu.matmul %88, %9, %cst_26 {dimension_numbers = #tpu.dot_dimension_numbers<[1], [0], [0], [1], [0, 0, 1, 1], [], []>} : vector<16x64xf32>, vector<64x32xf32>, vector<16x32xf32> -> vector<16x32xf32>
    %cst_27 = arith.constant dense<0.000000e+00> : vector<16xf32>
    %90 = vector.multi_reduction <add>, %88, %cst_27 [1] : vector<16x64xf32> to vector<16xf32>
    %91 = vector.shape_cast %90 : vector<16xf32> to vector<16x1xf32>
    %92 = tpu.reciprocal %91 {approx = true} : vector<16x1xf32> -> vector<16x1xf32>
    %93 = vector.broadcast %92 : vector<16x1xf32> to vector<16x32xf32>
    %94 = arith.mulf %89, %93 : vector<16x32xf32>
    %c4_i32 = arith.constant 4 : i32
    %95 = arith.mulf %94, %94 : vector<16x32xf32>
    %cst_28 = arith.constant dense<0.000000e+00> : vector<16xf32>
    %96 = vector.multi_reduction <add>, %95, %cst_28 [1] : vector<16x32xf32> to vector<16xf32>
    %97 = vector.shape_cast %96 : vector<16xf32> to vector<16x1xf32>
    %98 = math.rsqrt %97 : vector<16x1xf32>
    %cst_29 = arith.constant 3.000000e+01 : f32
    %99 = vector.broadcast %cst_29 : f32 to vector<16x1xf32>
    %100 = arith.mulf %98, %99 : vector<16x1xf32>
    %101 = vector.broadcast %100 : vector<16x1xf32> to vector<16x32xf32>
    %102 = arith.mulf %94, %101 : vector<16x32xf32>
    %cst_30 = arith.constant dense<0.000000e+00> : vector<16x64xf32>
    %103 = tpu.matmul %102, %9, %cst_30 {dimension_numbers = #tpu.dot_dimension_numbers<[1], [1], [0], [0], [0, 0, 1, 0], [], []>} : vector<16x32xf32>, vector<64x32xf32>, vector<16x64xf32> -> vector<16x64xf32>
    %104 = math.exp %103 : vector<16x64xf32>
    %cst_31 = arith.constant dense<0.000000e+00> : vector<64xf32>
    %105 = vector.multi_reduction <add>, %104, %cst_31 [0] : vector<16x64xf32> to vector<64xf32>
    %106 = vector.shape_cast %105 : vector<64xf32> to vector<1x64xf32>
    %107 = tpu.reciprocal %106 : vector<1x64xf32> -> vector<1x64xf32>
    %108 = vector.broadcast %107 : vector<1x64xf32> to vector<16x64xf32>
    %109 = arith.mulf %104, %108 : vector<16x64xf32>
    %cst_32 = arith.constant dense<0.000000e+00> : vector<16x32xf32>
    %110 = tpu.matmul %109, %9, %cst_32 {dimension_numbers = #tpu.dot_dimension_numbers<[1], [0], [0], [1], [0, 0, 1, 1], [], []>} : vector<16x64xf32>, vector<64x32xf32>, vector<16x32xf32> -> vector<16x32xf32>
    %cst_33 = arith.constant dense<0.000000e+00> : vector<16xf32>
    %111 = vector.multi_reduction <add>, %109, %cst_33 [1] : vector<16x64xf32> to vector<16xf32>
    %112 = vector.shape_cast %111 : vector<16xf32> to vector<16x1xf32>
    %113 = tpu.reciprocal %112 {approx = true} : vector<16x1xf32> -> vector<16x1xf32>
    %114 = vector.broadcast %113 : vector<16x1xf32> to vector<16x32xf32>
    %115 = arith.mulf %110, %114 : vector<16x32xf32>
    %c5_i32 = arith.constant 5 : i32
    %116 = arith.mulf %115, %115 : vector<16x32xf32>
    %cst_34 = arith.constant dense<0.000000e+00> : vector<16xf32>
    %117 = vector.multi_reduction <add>, %116, %cst_34 [1] : vector<16x32xf32> to vector<16xf32>
    %118 = vector.shape_cast %117 : vector<16xf32> to vector<16x1xf32>
    %119 = math.rsqrt %118 : vector<16x1xf32>
    %cst_35 = arith.constant 3.000000e+01 : f32
    %120 = vector.broadcast %cst_35 : f32 to vector<16x1xf32>
    %121 = arith.mulf %119, %120 : vector<16x1xf32>
    %122 = vector.broadcast %121 : vector<16x1xf32> to vector<16x32xf32>
    %123 = arith.mulf %115, %122 : vector<16x32xf32>
    %cst_36 = arith.constant dense<0.000000e+00> : vector<16x64xf32>
    %124 = tpu.matmul %123, %9, %cst_36 {dimension_numbers = #tpu.dot_dimension_numbers<[1], [1], [0], [0], [0, 0, 1, 0], [], []>} : vector<16x32xf32>, vector<64x32xf32>, vector<16x64xf32> -> vector<16x64xf32>
    %125 = math.exp %124 : vector<16x64xf32>
    %cst_37 = arith.constant dense<0.000000e+00> : vector<64xf32>
    %126 = vector.multi_reduction <add>, %125, %cst_37 [0] : vector<16x64xf32> to vector<64xf32>
    %127 = vector.shape_cast %126 : vector<64xf32> to vector<1x64xf32>
    %128 = tpu.reciprocal %127 : vector<1x64xf32> -> vector<1x64xf32>
    %129 = vector.broadcast %128 : vector<1x64xf32> to vector<16x64xf32>
    %130 = arith.mulf %125, %129 : vector<16x64xf32>
    %cst_38 = arith.constant dense<0.000000e+00> : vector<16x32xf32>
    %131 = tpu.matmul %130, %9, %cst_38 {dimension_numbers = #tpu.dot_dimension_numbers<[1], [0], [0], [1], [0, 0, 1, 1], [], []>} : vector<16x64xf32>, vector<64x32xf32>, vector<16x32xf32> -> vector<16x32xf32>
    %cst_39 = arith.constant dense<0.000000e+00> : vector<16xf32>
    %132 = vector.multi_reduction <add>, %130, %cst_39 [1] : vector<16x64xf32> to vector<16xf32>
    %133 = vector.shape_cast %132 : vector<16xf32> to vector<16x1xf32>
    %134 = tpu.reciprocal %133 {approx = true} : vector<16x1xf32> -> vector<16x1xf32>
    %135 = vector.broadcast %134 : vector<16x1xf32> to vector<16x32xf32>
    %136 = arith.mulf %131, %135 : vector<16x32xf32>
    %c6_i32 = arith.constant 6 : i32
    %137 = arith.mulf %136, %136 : vector<16x32xf32>
    %cst_40 = arith.constant dense<0.000000e+00> : vector<16xf32>
    %138 = vector.multi_reduction <add>, %137, %cst_40 [1] : vector<16x32xf32> to vector<16xf32>
    %139 = vector.shape_cast %138 : vector<16xf32> to vector<16x1xf32>
    %140 = math.rsqrt %139 : vector<16x1xf32>
    %cst_41 = arith.constant 3.000000e+01 : f32
    %141 = vector.broadcast %cst_41 : f32 to vector<16x1xf32>
    %142 = arith.mulf %140, %141 : vector<16x1xf32>
    %143 = vector.broadcast %142 : vector<16x1xf32> to vector<16x32xf32>
    %144 = arith.mulf %136, %143 : vector<16x32xf32>
    %cst_42 = arith.constant dense<0.000000e+00> : vector<16x64xf32>
    %145 = tpu.matmul %144, %9, %cst_42 {dimension_numbers = #tpu.dot_dimension_numbers<[1], [1], [0], [0], [0, 0, 1, 0], [], []>} : vector<16x32xf32>, vector<64x32xf32>, vector<16x64xf32> -> vector<16x64xf32>
    %146 = math.exp %145 : vector<16x64xf32>
    %cst_43 = arith.constant dense<0.000000e+00> : vector<64xf32>
    %147 = vector.multi_reduction <add>, %146, %cst_43 [0] : vector<16x64xf32> to vector<64xf32>
    %148 = vector.shape_cast %147 : vector<64xf32> to vector<1x64xf32>
    %149 = tpu.reciprocal %148 : vector<1x64xf32> -> vector<1x64xf32>
    %150 = vector.broadcast %149 : vector<1x64xf32> to vector<16x64xf32>
    %151 = arith.mulf %146, %150 : vector<16x64xf32>
    %cst_44 = arith.constant dense<0.000000e+00> : vector<16x32xf32>
    %152 = tpu.matmul %151, %9, %cst_44 {dimension_numbers = #tpu.dot_dimension_numbers<[1], [0], [0], [1], [0, 0, 1, 1], [], []>} : vector<16x64xf32>, vector<64x32xf32>, vector<16x32xf32> -> vector<16x32xf32>
    %cst_45 = arith.constant dense<0.000000e+00> : vector<16xf32>
    %153 = vector.multi_reduction <add>, %151, %cst_45 [1] : vector<16x64xf32> to vector<16xf32>
    %154 = vector.shape_cast %153 : vector<16xf32> to vector<16x1xf32>
    %155 = tpu.reciprocal %154 {approx = true} : vector<16x1xf32> -> vector<16x1xf32>
    %156 = vector.broadcast %155 : vector<16x1xf32> to vector<16x32xf32>
    %157 = arith.mulf %152, %156 : vector<16x32xf32>
    %c7_i32 = arith.constant 7 : i32
    %158 = arith.mulf %157, %157 : vector<16x32xf32>
    %cst_46 = arith.constant dense<0.000000e+00> : vector<16xf32>
    %159 = vector.multi_reduction <add>, %158, %cst_46 [1] : vector<16x32xf32> to vector<16xf32>
    %160 = vector.shape_cast %159 : vector<16xf32> to vector<16x1xf32>
    %161 = math.rsqrt %160 : vector<16x1xf32>
    %cst_47 = arith.constant 3.000000e+01 : f32
    %162 = vector.broadcast %cst_47 : f32 to vector<16x1xf32>
    %163 = arith.mulf %161, %162 : vector<16x1xf32>
    %164 = vector.broadcast %163 : vector<16x1xf32> to vector<16x32xf32>
    %165 = arith.mulf %157, %164 : vector<16x32xf32>
    %cst_48 = arith.constant dense<0.000000e+00> : vector<16x64xf32>
    %166 = tpu.matmul %165, %9, %cst_48 {dimension_numbers = #tpu.dot_dimension_numbers<[1], [1], [0], [0], [0, 0, 1, 0], [], []>} : vector<16x32xf32>, vector<64x32xf32>, vector<16x64xf32> -> vector<16x64xf32>
    %167 = math.exp %166 : vector<16x64xf32>
    %cst_49 = arith.constant dense<0.000000e+00> : vector<64xf32>
    %168 = vector.multi_reduction <add>, %167, %cst_49 [0] : vector<16x64xf32> to vector<64xf32>
    %169 = vector.shape_cast %168 : vector<64xf32> to vector<1x64xf32>
    %170 = tpu.reciprocal %169 : vector<1x64xf32> -> vector<1x64xf32>
    %171 = vector.broadcast %170 : vector<1x64xf32> to vector<16x64xf32>
    %172 = arith.mulf %167, %171 : vector<16x64xf32>
    %cst_50 = arith.constant dense<0.000000e+00> : vector<16x32xf32>
    %173 = tpu.matmul %172, %9, %cst_50 {dimension_numbers = #tpu.dot_dimension_numbers<[1], [0], [0], [1], [0, 0, 1, 1], [], []>} : vector<16x64xf32>, vector<64x32xf32>, vector<16x32xf32> -> vector<16x32xf32>
    %cst_51 = arith.constant dense<0.000000e+00> : vector<16xf32>
    %174 = vector.multi_reduction <add>, %172, %cst_51 [1] : vector<16x64xf32> to vector<16xf32>
    %175 = vector.shape_cast %174 : vector<16xf32> to vector<16x1xf32>
    %176 = tpu.reciprocal %175 {approx = true} : vector<16x1xf32> -> vector<16x1xf32>
    %177 = vector.broadcast %176 : vector<16x1xf32> to vector<16x32xf32>
    %178 = arith.mulf %173, %177 : vector<16x32xf32>
    %c8_i32 = arith.constant 8 : i32
    %179 = arith.mulf %178, %178 : vector<16x32xf32>
    %cst_52 = arith.constant dense<0.000000e+00> : vector<16xf32>
    %180 = vector.multi_reduction <add>, %179, %cst_52 [1] : vector<16x32xf32> to vector<16xf32>
    %181 = vector.shape_cast %180 : vector<16xf32> to vector<16x1xf32>
    %182 = math.rsqrt %181 : vector<16x1xf32>
    %cst_53 = arith.constant 3.000000e+01 : f32
    %183 = vector.broadcast %cst_53 : f32 to vector<16x1xf32>
    %184 = arith.mulf %182, %183 : vector<16x1xf32>
    %185 = vector.broadcast %184 : vector<16x1xf32> to vector<16x32xf32>
    %186 = arith.mulf %178, %185 : vector<16x32xf32>
    %cst_54 = arith.constant dense<0.000000e+00> : vector<16x64xf32>
    %187 = tpu.matmul %186, %9, %cst_54 {dimension_numbers = #tpu.dot_dimension_numbers<[1], [1], [0], [0], [0, 0, 1, 0], [], []>} : vector<16x32xf32>, vector<64x32xf32>, vector<16x64xf32> -> vector<16x64xf32>
    %188 = math.exp %187 : vector<16x64xf32>
    %cst_55 = arith.constant dense<0.000000e+00> : vector<64xf32>
    %189 = vector.multi_reduction <add>, %188, %cst_55 [0] : vector<16x64xf32> to vector<64xf32>
    %190 = vector.shape_cast %189 : vector<64xf32> to vector<1x64xf32>
    %191 = tpu.reciprocal %190 : vector<1x64xf32> -> vector<1x64xf32>
    %192 = vector.broadcast %191 : vector<1x64xf32> to vector<16x64xf32>
    %193 = arith.mulf %188, %192 : vector<16x64xf32>
    %cst_56 = arith.constant dense<0.000000e+00> : vector<16x32xf32>
    %194 = tpu.matmul %193, %9, %cst_56 {dimension_numbers = #tpu.dot_dimension_numbers<[1], [0], [0], [1], [0, 0, 1, 1], [], []>} : vector<16x64xf32>, vector<64x32xf32>, vector<16x32xf32> -> vector<16x32xf32>
    %cst_57 = arith.constant dense<0.000000e+00> : vector<16xf32>
    %195 = vector.multi_reduction <add>, %193, %cst_57 [1] : vector<16x64xf32> to vector<16xf32>
    %196 = vector.shape_cast %195 : vector<16xf32> to vector<16x1xf32>
    %197 = tpu.reciprocal %196 {approx = true} : vector<16x1xf32> -> vector<16x1xf32>
    %198 = vector.broadcast %197 : vector<16x1xf32> to vector<16x32xf32>
    %199 = arith.mulf %194, %198 : vector<16x32xf32>
    %c9_i32 = arith.constant 9 : i32
    %200 = arith.mulf %199, %199 : vector<16x32xf32>
    %cst_58 = arith.constant dense<0.000000e+00> : vector<16xf32>
    %201 = vector.multi_reduction <add>, %200, %cst_58 [1] : vector<16x32xf32> to vector<16xf32>
    %202 = vector.shape_cast %201 : vector<16xf32> to vector<16x1xf32>
    %203 = math.rsqrt %202 : vector<16x1xf32>
    %cst_59 = arith.constant 3.000000e+01 : f32
    %204 = vector.broadcast %cst_59 : f32 to vector<16x1xf32>
    %205 = arith.mulf %203, %204 : vector<16x1xf32>
    %206 = vector.broadcast %205 : vector<16x1xf32> to vector<16x32xf32>
    %207 = arith.mulf %199, %206 : vector<16x32xf32>
    %cst_60 = arith.constant dense<0.000000e+00> : vector<16x64xf32>
    %208 = tpu.matmul %207, %9, %cst_60 {dimension_numbers = #tpu.dot_dimension_numbers<[1], [1], [0], [0], [0, 0, 1, 0], [], []>} : vector<16x32xf32>, vector<64x32xf32>, vector<16x64xf32> -> vector<16x64xf32>
    %209 = math.exp %208 : vector<16x64xf32>
    %cst_61 = arith.constant dense<0.000000e+00> : vector<64xf32>
    %210 = vector.multi_reduction <add>, %209, %cst_61 [0] : vector<16x64xf32> to vector<64xf32>
    %211 = vector.shape_cast %210 : vector<64xf32> to vector<1x64xf32>
    %212 = tpu.reciprocal %211 : vector<1x64xf32> -> vector<1x64xf32>
    %213 = vector.broadcast %212 : vector<1x64xf32> to vector<16x64xf32>
    %214 = arith.mulf %209, %213 : vector<16x64xf32>
    %cst_62 = arith.constant dense<0.000000e+00> : vector<16x32xf32>
    %215 = tpu.matmul %214, %9, %cst_62 {dimension_numbers = #tpu.dot_dimension_numbers<[1], [0], [0], [1], [0, 0, 1, 1], [], []>} : vector<16x64xf32>, vector<64x32xf32>, vector<16x32xf32> -> vector<16x32xf32>
    %cst_63 = arith.constant dense<0.000000e+00> : vector<16xf32>
    %216 = vector.multi_reduction <add>, %214, %cst_63 [1] : vector<16x64xf32> to vector<16xf32>
    %217 = vector.shape_cast %216 : vector<16xf32> to vector<16x1xf32>
    %218 = tpu.reciprocal %217 {approx = true} : vector<16x1xf32> -> vector<16x1xf32>
    %219 = vector.broadcast %218 : vector<16x1xf32> to vector<16x32xf32>
    %220 = arith.mulf %215, %219 : vector<16x32xf32>
    %221 = arith.mulf %220, %220 : vector<16x32xf32>
    %cst_64 = arith.constant dense<0.000000e+00> : vector<16xf32>
    %222 = vector.multi_reduction <add>, %221, %cst_64 [1] : vector<16x32xf32> to vector<16xf32>
    %223 = vector.shape_cast %222 : vector<16xf32> to vector<16x1xf32>
    %224 = math.rsqrt %223 : vector<16x1xf32>
    %cst_65 = arith.constant 3.000000e+01 : f32
    %225 = vector.broadcast %cst_65 : f32 to vector<16x1xf32>
    %226 = arith.mulf %224, %225 : vector<16x1xf32>
    %227 = vector.broadcast %226 : vector<16x1xf32> to vector<16x32xf32>
    %228 = arith.mulf %220, %227 : vector<16x32xf32>
    %cst_66 = arith.constant dense<0.000000e+00> : vector<16x64xf32>
    %229 = tpu.matmul %228, %9, %cst_66 {dimension_numbers = #tpu.dot_dimension_numbers<[1], [1], [0], [0], [0, 0, 1, 0], [], []>} : vector<16x32xf32>, vector<64x32xf32>, vector<16x64xf32> -> vector<16x64xf32>
    %230 = math.exp %229 : vector<16x64xf32>
    %cst_67 = arith.constant dense<0.000000e+00> : vector<64xf32>
    %231 = vector.multi_reduction <add>, %230, %cst_67 [0] : vector<16x64xf32> to vector<64xf32>
    %232 = vector.shape_cast %231 : vector<64xf32> to vector<1x64xf32>
    %233 = tpu.reciprocal %232 : vector<1x64xf32> -> vector<1x64xf32>
    %234 = vector.broadcast %233 : vector<1x64xf32> to vector<16x64xf32>
    %235 = arith.mulf %230, %234 : vector<16x64xf32>
    %cst_68 = arith.constant dense<0.000000e+00> : vector<16x32xf32>
    %236 = tpu.matmul %235, %9, %cst_68 {dimension_numbers = #tpu.dot_dimension_numbers<[1], [0], [0], [1], [0, 0, 1, 1], [], []>} : vector<16x64xf32>, vector<64x32xf32>, vector<16x32xf32> -> vector<16x32xf32>
    %cst_69 = arith.constant dense<0.000000e+00> : vector<16xf32>
    %237 = vector.multi_reduction <add>, %235, %cst_69 [1] : vector<16x64xf32> to vector<16xf32>
    %238 = vector.shape_cast %237 : vector<16xf32> to vector<16x1xf32>
    %c0_70 = arith.constant 0 : index
    %c0_71 = arith.constant 0 : index
    %239 = vector.load %arg3[%c0_70, %c0_71] : memref<16x64xf32, #tpu.memory_space<vmem>>, vector<16x64xf32>
    tpu.vector_store %arg3[%c0_70, %c0_71], %235 {strides = array<i32>} : memref<16x64xf32, #tpu.memory_space<vmem>>, vector<16x64xf32>,
    %240 = tpu.reciprocal %238 : vector<16x1xf32> -> vector<16x1xf32>
    %241 = vector.broadcast %240 : vector<16x1xf32> to vector<16x32xf32>
    %242 = arith.mulf %236, %241 : vector<16x32xf32>
    %c0_72 = arith.constant 0 : index
    %c0_73 = arith.constant 0 : index
    %243 = vector.load %arg2[%c0_72, %c0_73] : memref<16x32xf32, #tpu.memory_space<vmem>>, vector<16x32xf32>
    tpu.vector_store %arg2[%c0_72, %c0_73], %242 {strides = array<i32>} : memref<16x32xf32, #tpu.memory_space<vmem>>, vector<16x32xf32>,
    return
  }
}

</mosaic_0001>

<bundles_post_ra>
// kernel: tpu_custom_call.1
= control target key start
LH: loop header
LB: loop body
LE: loop exit
PB: predicated region body
PF: predicated region fallthrough
CT: control target
= control target key end

     0   :  { %9 = vsyncpa [#allocation3], 0  ;;  %vm31_vm0 = vcmask 261120   ;;  %s2915_s0 = inlined_call_operand.vmem [shape: f32[64,32], index: 0, kind: input, shape index: {}]   ;;  %s2916_s1 = inlined_call_operand.vmem [shape: f32[16,32], index: 1, kind: input, shape index: {}]   ;;  %s2917_s2 = inlined_call_operand.hbm [shape: f32[16,32], index: 2, kind: output, shape index: {0}]   ;;  %s2918_s3 = inlined_call_operand.hbm [shape: f32[16,64], index: 3, kind: output, shape index: {1}]  }
   0x1   :  { %v2193_v0 = vld [vmem:[%s2915_s0 + $0x38] sm:$0xff]  ;;  %v2198_v1 = vld [vmem:[%s2915_s0 + $0x28] sm:$0xff]  ;;  %v2214_v6 = vld [vmem:[%s2915_s0 + $0x30] sm:$0xff] }
   0x2   :  { %v2203_v2 = vld [vmem:[%s2915_s0 + $0x18] sm:$0xff]  ;;  %v30_v3 = vmul.f32 %v2193_v0, %v2193_v0  ;;  %v28_v4 = vmul.f32 %v2198_v1, %v2198_v1  ;;  %v2219_v7 = vld [vmem:[%s2915_s0 + $0x20] sm:$0xff]  ;;  %v2227_v11 = vld [vmem:[%s2915_s0 + $0x10] sm:$0xff] }
   0x3   :  { %v26_v5 = vmul.f32 %v2203_v2, %v2203_v2 }
   0x4   :  { %v53_v8 = vsel %vm31_vm0, %v30_v3, 0.0  ;;  %v47_v9 = vsel %vm31_vm0, %v28_v4, 0.0 }
   0x5   :  { %v41_v10 = vsel %vm31_vm0, %v26_v5, 0.0 }
   0x6   :  { %10 = vsyncpa [#allocation5], 0  ;;  %54 = vadd.xlane.f32.xlu0 %v53_v8  ;;  %48 = vadd.xlane.f32.xlu1 %v47_v9  ;;  %v29_v12 = vmul.f32 %v2214_v6, %v2214_v6  ;;  %v27_v13 = vmul.f32 %v2219_v7, %v2219_v7  ;;  %v25_v14 = vmul.f32 %v2227_v11, %v2227_v11  ;;  %v2241_v18 = vld [vmem:[%s2915_s0 + $0x8] sm:$0xff]  ;;  %v2246_v19 = vld [vmem:[%s2915_s0] sm:$0xff]  ;;  %s1775_s7 = sshll.u32 %s2918_s3, 4  ;;  %s2167_s8 = smov 128   ;;  %s1776_s7 = int_to_ptr.hbm [resolvable:$true] %s1775_s7 }
   0x7   :  { %42 = vadd.xlane.f32.xlu2 %v41_v10  ;;  %v2251_v20 = vld [vmem:[%s2916_s1] sm:$0xff]  ;;  %v24_v21 = vmul.f32 %v2241_v18, %v2241_v18  ;;  %v23_v22 = vmul.f32 %v2246_v19, %v2246_v19  ;;  %v2265_v27 = vld [vmem:[%s2916_s1 + $0x8] sm:$0xff]  ;;  %s2166_s1 = smov [#allocation4]   ;;  %s2168_s9 = smov 8  }
   0x8   :  { %v50_v15 = vsel %vm31_vm0, %v29_v12, 0.0  ;;  %v44_v16 = vsel %vm31_vm0, %v27_v13, 0.0  ;;  %v38_v17 = vsel %vm31_vm0, %v25_v14, 0.0  ;;  %v282_v23 = vmul.f32 %v2251_v20, %v2251_v20  ;;  %s1773_s4 = sshll.u32 %s2166_s1, 4  ;;  %s2169_s3 = smov [#allocation2]   ;;  %s1774_s4 = int_to_ptr.vmem [resolvable:$true] %s1773_s4 }
   0x9   :  { %v35_v24 = vsel %vm31_vm0, %v24_v21, 0.0  ;;  %v32_v25 = vsel %vm31_vm0, %v23_v22, 0.0  ;;  %v283_v28 = vmul.f32 %v2265_v27, %v2265_v27  ;;  %s1760_s10 = sshll.u32 %s2169_s3, 4  ;;  %s1762_s13 = sshll.u32 %s2917_s2, 4  ;;  %s1761_s10 = int_to_ptr.vmem [resolvable:$true] %s1760_s10  ;;  %s1763_s13 = int_to_ptr.hbm [resolvable:$true] %s1762_s13 }
   0xa   :  { %v284_v26 = vsel %vm31_vm0, %v282_v23, 0.0 }
   0xb   :  { %v287_v29 = vsel %vm31_vm0, %v283_v28, 0.0 }
   0xe   :  { %51 = vadd.xlane.f32.xlu0 %v50_v15  ;;  %45 = vadd.xlane.f32.xlu1 %v44_v16 }
   0xf   :  { %39 = vadd.xlane.f32.xlu2 %v38_v17 }
  0x16   :  { %36 = vadd.xlane.f32.xlu0 %v35_v24  ;;  %33 = vadd.xlane.f32.xlu1 %v32_v25 }
  0x17   :  { %285 = vadd.xlane.f32.xlu2 %v284_v26 }
  0x1e   :  { %288 = vadd.xlane.f32.xlu0 %v287_v29 }
  0x79   :  { %v55_v30 = vpop.xlane.xlu0 %54  ;;  %v49_v31 = vpop.xlane.xlu1 %48 }
  0x7a   :  { %1928 = vrsqrt.f32 %v55_v30  ;;  %v2270_v32 = vpop.xlane.xlu2 %42  ;;  %vm147_vm1 = vcmp.eq.f32.partialorder %v55_v30, inf  ;;  %vm149_vm2 = vcmp.eq.f32.partialorder %v55_v30, 0.0  ;;  %v150_v50 = vand.u32 2147483648, %v55_v30 }
  0x7b   :  { %1930 = vrsqrt.f32 %v49_v31  ;;  %vm123_vm3 = vcmp.eq.f32.partialorder %v49_v31, inf  ;;  %vm125_vm4 = vcmp.eq.f32.partialorder %v49_v31, 0.0  ;;  %v126_v54 = vand.u32 2147483648, %v49_v31 }
  0x7c   :  { %1932 = vrsqrt.f32 %v2270_v32  ;;  %vm99_vm5 = vcmp.eq.f32.partialorder %v2270_v32, inf  ;;  %vm101_vm6 = vcmp.eq.f32.partialorder %v2270_v32, 0.0  ;;  %v102_v3 = vand.u32 2147483648, %v2270_v32 }
  0x80   :  { %v1929_v33 = vpop.eup %1928 }
  0x81   :  { %v1931_v34 = vpop.eup %1930  ;;  %v141_v35 = vmul.f32 %v1929_v33, %v55_v30  ;;  %v2273_v36 = vpop.xlane.xlu0 %51 }
  0x82   :  { %v2275_v37 = vpop.xlane.xlu1 %45  ;;  %v1933_v38 = vpop.eup %1932  ;;  %v117_v39 = vmul.f32 %v1931_v34, %v49_v31  ;;  %1934 = vrsqrt.f32 %v2273_v36  ;;  %vm135_vm7 = vcmp.eq.f32.partialorder %v2273_v36, inf  ;;  %vm137_vm8 = vcmp.eq.f32.partialorder %v2273_v36, 0.0 }
  0x83   :  { %v2278_v40 = vpop.xlane.xlu2 %39  ;;  %v142_v41 = vmul.f32 %v1929_v33, %v141_v35  ;;  %v93_v42 = vmul.f32 %v1933_v38, %v2270_v32  ;;  %1936 = vrsqrt.f32 %v2275_v37  ;;  %vm111_vm9 = vcmp.eq.f32.partialorder %v2275_v37, inf }
  0x84   :  { %v118_v43 = vmul.f32 %v1931_v34, %v117_v39  ;;  %1938 = vrsqrt.f32 %v2278_v40  ;;  %vm113_vm10 = vcmp.eq.f32.partialorder %v2275_v37, 0.0  ;;  %vm87_vm11 = vcmp.eq.f32.partialorder %v2278_v40, inf }
  0x85   :  { %v143_v44 = vmul.f32 0.5, %v142_v41  ;;  %v94_v45 = vmul.f32 %v1933_v38, %v93_v42  ;;  %v114_v42 = vand.u32 2147483648, %v2275_v37  ;;  %vm89_vm12 = vcmp.eq.f32.partialorder %v2278_v40, 0.0 }
  0x86   :  { %v119_v46 = vmul.f32 0.5, %v118_v43 }
  0x87   :  { %v144_v47 = vsub.f32 1.5, %v143_v44  ;;  %v95_v48 = vmul.f32 0.5, %v94_v45  ;;  %v90_v45 = vand.u32 2147483648, %v2278_v40 }
  0x88   :  { %v1935_v49 = vpop.eup %1934  ;;  %v120_v51 = vsub.f32 1.5, %v119_v46 }
  0x89   :  { %v1937_v52 = vpop.eup %1936  ;;  %v145_v53 = vmul.f32 %v1929_v33, %v144_v47  ;;  %v96_v55 = vsub.f32 1.5, %v95_v48  ;;  %v129_v56 = vmul.f32 %v1935_v49, %v2273_v36  ;;  %v2284_v57 = vpop.xlane.xlu0 %36 }
  0x8a   :  { %v121_v58 = vmul.f32 %v1931_v34, %v120_v51  ;;  %v105_v59 = vmul.f32 %v1937_v52, %v2275_v37  ;;  %v2289_v60 = vpop.xlane.xlu1 %33  ;;  %v1939_v61 = vpop.eup %1938  ;;  %1940 = vrsqrt.f32 %v2284_v57  ;;  %v78_v46 = vand.u32 2147483648, %v2284_v57 }
  0x8b   :  { %v146_v62 = vmul.f32 %v145_v53, %v55_v30  ;;  %v97_v63 = vmul.f32 %v1933_v38, %v96_v55  ;;  %v130_v4 = vmul.f32 %v1935_v49, %v129_v56  ;;  %v81_v9 = vmul.f32 %v1939_v61, %v2278_v40 }
  0x8c   :  { %v122_v5 = vmul.f32 %v121_v58, %v49_v31  ;;  %v106_v8 = vmul.f32 %v1937_v52, %v105_v59  ;;  %1942 = vrsqrt.f32 %v2289_v60 }
  0x8d   :  { %v148_v10 = vsel %vm147_vm1, %v55_v30, %v146_v62  ;;  %v98_v12 = vmul.f32 %v97_v63, %v2270_v32  ;;  %v131_v13 = vmul.f32 0.5, %v130_v4  ;;  %v82_v17 = vmul.f32 %v1939_v61, %v81_v9 }
  0x8e   :  { %v151_v14 = vsel %vm149_vm2, %v150_v50, %v148_v10  ;;  %v124_v15 = vsel %vm123_vm3, %v49_v31, %v122_v5  ;;  %v107_v16 = vmul.f32 0.5, %v106_v8 }
  0x8f   :  { %v159_v21 = vadd.f32 1e-08, %v151_v14  ;;  %v127_v22 = vsel %vm125_vm4, %v126_v54, %v124_v15  ;;  %v100_v23 = vsel %vm99_vm5, %v2270_v32, %v98_v12  ;;  %v132_v24 = vsub.f32 1.5, %v131_v13 }
  0x90   :  { %v2303_v25 = vadd.f32 1e-08, %v127_v22  ;;  %v103_v26 = vsel %vm101_vm6, %v102_v3, %v100_v23  ;;  %v108_v28 = vsub.f32 1.5, %v107_v16  ;;  %v83_v29 = vmul.f32 0.5, %v82_v17  ;;  %v2307_v30 = vpop.eup %1940 }
  0x91   :  { %1944 = vrcp.f32 %v159_v21  ;;  %v2312_v31 = vadd.f32 1e-08, %v103_v26  ;;  %v133_v34 = vmul.f32 %v1935_v49, %v132_v24  ;;  %v138_v32 = vand.u32 2147483648, %v2273_v36 }
  0x92   :  { %1946 = vrcp.f32 %v2303_v25  ;;  %v2310_v33 = vpop.eup %1942  ;;  %v109_v35 = vmul.f32 %v1937_v52, %v108_v28  ;;  %v84_v38 = vsub.f32 1.5, %v83_v29  ;;  %v267_v44 = vand.u32 2147483647, %v159_v21 }
  0x93   :  { %1948 = vrcp.f32 %v2312_v31  ;;  %v134_v39 = vmul.f32 %v133_v34, %v2273_v36  ;;  %v239_v53 = vand.u32 2147483647, %v2303_v25  ;;  %v269_v58 = vand.u32 2147483648, %v159_v21 }
  0x94   :  { %v110_v41 = vmul.f32 %v109_v35, %v2275_v37  ;;  %v85_v51 = vmul.f32 %v1939_v61, %v84_v38  ;;  %v69_v3 = vmul.f32 %v2307_v30, %v2284_v57  ;;  %vm263_vm14 = vweird.f32 %v159_v21 }
  0x95   :  { %v136_v49 = vsel %vm135_vm7, %v2273_v36, %v134_v39  ;;  %v57_v36 = vmul.f32 %v2310_v33, %v2289_v60  ;;  %vm235_vm15 = vweird.f32 %v2303_v25  ;;  %v241_v9 = vand.u32 2147483648, %v2303_v25 }
  0x96   :  { %v112_v50 = vsel %vm111_vm9, %v2275_v37, %v110_v41  ;;  %v139_v54 = vsel %vm137_vm8, %v138_v32, %v136_v49  ;;  %v86_v5 = vmul.f32 %v85_v51, %v2278_v40  ;;  %vm268_vm1 = vcmp.eq.f32.partialorder %v267_v44, 8.507059e+37  ;;  %v2405_v51 = vpop.xlane.xlu2 %285 }
  0x97   :  { %v1945_v43 = vpop.eup %1944  ;;  %v115_v55 = vsel %vm113_vm10, %v114_v42, %v112_v50  ;;  %v2340_v59 = vadd.f32 1e-08, %v139_v54  ;;  %v270_v13 = vor.u32 1.1754944e-38, %v269_v58  ;;  %vm2359_vm3 = vcmp.eq.f32.partialorder %v239_v53, 8.507059e+37 }
  0x98   :  { %v2326_v47 = vpop.eup %1946  ;;  %v259_v48 = vmul.f32 %v1945_v43, %v159_v21  ;;  %v2342_v62 = vadd.f32 1e-08, %v115_v55  ;;  %vm264_vm13 = vweird.f32 %v1945_v43  ;;  %v211_v15 = vand.u32 2147483647, %v2312_v31 }
  0x99   :  { %v231_v52 = vmul.f32 %v2326_v47, %v2303_v25  ;;  %v2344_v61 = vpop.eup %1948  ;;  %1950 = vrcp.f32 %v2340_v59  ;;  %vm265_vm2 = vmor %vm263_vm14, %vm264_vm13  ;;  %v213_v16 = vand.u32 2147483648, %v2312_v31  ;;  %v88_v21 = vsel %vm87_vm11, %v2278_v40, %v86_v5 }
  0x9a   :  { %v260_v56 = vsub.f32 1.0, %v259_v48  ;;  %v203_v37 = vmul.f32 %v2344_v61, %v2312_v31  ;;  %1952 = vrcp.f32 %v2342_v62  ;;  %v70_v22 = vmul.f32 %v2307_v30, %v69_v3 }
  0x9b   :  { %v232_v63 = vsub.f32 1.0, %v231_v52  ;;  %v58_v23 = vmul.f32 %v2310_v33, %v57_v36  ;;  %vm236_vm4 = vweird.f32 %v2326_v47  ;;  %v91_v28 = vsel %vm89_vm12, %v90_v45, %v88_v21 }
  0x9c   :  { %v261_v4 = vmul.f32 %v1945_v43, %v260_v56  ;;  %v204_v12 = vsub.f32 1.0, %v203_v37  ;;  %v242_v35 = vor.u32 1.1754944e-38, %v241_v9  ;;  %vm207_vm5 = vweird.f32 %v2312_v31  ;;  %vm2385_vm7 = vmor %vm235_vm15, %vm236_vm4 }
  0x9d   :  { %v233_v8 = vmul.f32 %v2326_v47, %v232_v63  ;;  %vm208_vm6 = vweird.f32 %v2344_v61  ;;  %v214_v32 = vor.u32 1.1754944e-38, %v213_v16  ;;  %v2381_v41 = vadd.f32 1e-08, %v91_v28 }
  0x9e   :  { %v262_v10 = vadd.f32 %v1945_v43, %v261_v4  ;;  %v205_v38 = vmul.f32 %v2344_v61, %v204_v12  ;;  %vm249_vm8 = vweird.f32 %v2340_v59  ;;  %v59_v44 = vmul.f32 0.5, %v58_v23 }
  0x9f   :  { %v234_v26 = vadd.f32 %v2326_v47, %v233_v8  ;;  %v1951_v29 = vpop.eup %1950  ;;  %vm2397_vm9 = vcmp.eq.f32.partialorder %v211_v15, 8.507059e+37  ;;  %v255_v49 = vand.u32 2147483648, %v2340_v59  ;;  %vm75_vm10 = vcmp.eq.f32.partialorder %v2284_v57, inf }
  0xa0   :  { %v266_v17 = vsel %vm265_vm2, %v1945_v43, %v262_v10  ;;  %v245_v39 = vmul.f32 %v1951_v29, %v2340_v59  ;;  %v1953_v42 = vpop.eup %1952  ;;  %v71_v43 = vmul.f32 0.5, %v70_v22  ;;  %vm63_vm11 = vcmp.eq.f32.partialorder %v2289_v60, inf }
  0xa1   :  { %v271_v24 = vsel %vm268_vm1, %v270_v13, %v266_v17  ;;  %v238_v45 = vsel %vm2385_vm7, %v2326_v47, %v234_v26  ;;  %v217_v50 = vmul.f32 %v1953_v42, %v2342_v62  ;;  %v206_v47 = vadd.f32 %v2344_v61, %v205_v38  ;;  %vm2424_vm1 = vmor %vm207_vm5, %vm208_vm6 }
  0xa2   :  { %v2375_v34 = vmul.f32 %v271_v24, %v2193_v0  ;;  %v253_v0 = vand.u32 2147483647, %v2340_v59  ;;  %v246_v48 = vsub.f32 1.0, %v245_v39  ;;  %vm221_vm12 = vweird.f32 %v2342_v62 }
  0xa3   :  { %v225_v52 = vand.u32 2147483647, %v2342_v62  ;;  %1954 = vrcp.f32 %v2381_v41  ;;  %vm77_vm13 = vcmp.eq.f32.partialorder %v2284_v57, 0.0  ;;  %vm65_vm14 = vcmp.eq.f32.partialorder %v2289_v60, 0.0 }
  0xa4   :  { %1792 = vmatpush.xpose.msk.msra.mxu0 %vm31_vm0, %v2375_v34  ;;  %411 = vmatpush.msra.mxu1 %v2375_v34  ;;  %v247_v53 = vmul.f32 %v1951_v29, %v246_v48  ;;  %vm250_vm15 = vweird.f32 %v1951_v29  ;;  %v218_v54 = vsub.f32 1.0, %v217_v50  ;;  %v72_v55 = vsub.f32 1.5, %v71_v43 }
  0xa5   :  { %1804 = vmatpush.xpose.msk.msra.mxu2 %vm31_vm0, %v2375_v34  ;;  %540 = vmatpush.msra.mxu3 %v2375_v34  ;;  %v243_v56 = vsel %vm2359_vm3, %v242_v35, %v238_v45  ;;  %v227_v58 = vand.u32 2147483648, %v2342_v62  ;;  %v60_v63 = vsub.f32 1.5, %v59_v44  ;;  %1956 = vrsqrt.f32 %v2405_v51  ;;  %vm251_vm3 = vmor %vm249_vm8, %vm250_vm15 }
  0xa6   :  { %v248_v36 = vadd.f32 %v1951_v29, %v247_v53  ;;  %v219_v4 = vmul.f32 %v1953_v42, %v218_v54  ;;  %vm222_vm2 = vweird.f32 %v1953_v42  ;;  %v73_v37 = vmul.f32 %v2307_v30, %v72_v55 }
  0xa7   :  { %vm254_vm4 = vcmp.eq.f32.partialorder %v253_v0, 8.507059e+37  ;;  %v256_v5 = vor.u32 1.1754944e-38, %v255_v49  ;;  %vm2431_vm7 = vcmp.eq.f32.partialorder %v225_v52, 8.507059e+37  ;;  %v61_v31 = vmul.f32 %v2310_v33, %v60_v63  ;;  %vm223_vm5 = vmor %vm221_vm12, %vm222_vm2  ;;  %v2446_v33 = vpop.xlane.xlu0 %288 }
  0xa8   :  { %v210_v9 = vsel %vm2424_vm1, %v2344_v61, %v206_v47  ;;  %v252_v10 = vsel %vm251_vm3, %v1951_v29, %v248_v36  ;;  %v220_v12 = vadd.f32 %v1953_v42, %v219_v4  ;;  %v74_v13 = vmul.f32 %v73_v37, %v2284_v57 }
  0xa9   :  { %v1955_v30 = vpop.eup %1954  ;;  %v2441_v59 = vmul.f32 %v243_v56, %v2198_v1  ;;  %v257_v14 = vsel %vm254_vm4, %v256_v5, %v252_v10  ;;  %v228_v15 = vor.u32 1.1754944e-38, %v227_v58  ;;  %v62_v16 = vmul.f32 %v61_v31, %v2289_v60 }
  0xaa   :  { %v2449_v17 = vmul.f32 %v257_v14, %v2214_v6  ;;  %v224_v61 = vsel %vm223_vm5, %v1953_v42, %v220_v12  ;;  %v189_v21 = vmul.f32 %v1955_v30, %v2381_v41  ;;  %v66_v22 = vand.u32 2147483648, %v2289_v60 }
  0xab   :  { %v2453_v23 = vpop.eup %1956  ;;  %v215_v1 = vsel %vm2397_vm9, %v214_v32, %v210_v9  ;;  %v229_v62 = vsel %vm2431_vm7, %v228_v15, %v224_v61  ;;  %v76_v24 = vsel %vm75_vm10, %v2284_v57, %v74_v13  ;;  %v64_v6 = vsel %vm63_vm11, %v2289_v60, %v62_v16 }
  0xac   :  { %v190_v26 = vsub.f32 1.0, %v189_v21  ;;  %v79_v28 = vsel %vm77_vm13, %v78_v46, %v76_v24  ;;  %v67_v29 = vsel %vm65_vm14, %v66_v22, %v64_v6  ;;  %1958 = vrsqrt.f32 %v2446_v33  ;;  %1793 = vmatpush.xpose.msk.msra.mxu0 %vm31_vm0, %v2449_v17  ;;  %412 = vmatpush.msra.mxu1 %v2449_v17 }
  0xad   :  { %v199_v35 = vand.u32 2147483648, %v2381_v41  ;;  %v2476_v38 = vadd.f32 1e-08, %v79_v28  ;;  %v2478_v32 = vadd.f32 1e-08, %v67_v29  ;;  %v291_v57 = vmul.f32 %v2453_v23, %v2405_v51  ;;  %1805 = vmatpush.xpose.msk.msra.mxu2 %vm31_vm0, %v2449_v17  ;;  %541 = vmatpush.msra.mxu3 %v2449_v17 }
  0xae   :  { %v2486_v60 = vmul.f32 %v229_v62, %v2219_v7  ;;  %v191_v46 = vmul.f32 %v1955_v30, %v190_v26  ;;  %vm194_vm6 = vweird.f32 %v1955_v30  ;;  %v197_v39 = vand.u32 2147483647, %v2381_v41  ;;  %413 = vmatpush.msra.mxu1 %v2441_v59 }
  0xaf   :  { %1960 = vrcp.f32 %v2476_v38  ;;  %542 = vmatpush.msra.mxu3 %v2441_v59  ;;  %v2493_v42 = vmul.f32 %v215_v1, %v2203_v2  ;;  %vm193_vm8 = vweird.f32 %v2381_v41  ;;  %v200_v7 = vor.u32 1.1754944e-38, %v199_v35 }
  0xb0   :  { %v192_v40 = vadd.f32 %v1955_v30, %v191_v46  ;;  %1962 = vrcp.f32 %v2478_v32  ;;  %1794 = vmatpush.xpose.msk.msra.mxu0 %vm31_vm0, %v2441_v59  ;;  %414 = vmatpush.msra.mxu1 %v2486_v60  ;;  %vm195_vm9 = vmor %vm193_vm8, %vm194_vm6  ;;  %v292_v0 = vmul.f32 %v2453_v23, %v291_v57  ;;  %vm198_vm10 = vcmp.eq.f32.partialorder %v197_v39, 8.507059e+37 }
  0xb1   :  { %1806 = vmatpush.xpose.msk.msra.mxu2 %vm31_vm0, %v2441_v59  ;;  %543 = vmatpush.msra.mxu3 %v2486_v60  ;;  %vm296_vm11 = vweird.f32 %v2405_v51  ;;  %vm297_vm12 = vweird.f32 %v2453_v23  ;;  %v185_v52 = vand.u32 2147483648, %v2476_v38  ;;  %v183_v58 = vand.u32 2147483647, %v2476_v38 }
  0xb2   :  { %v2504_v2 = vpop.eup %1958  ;;  %v196_v43 = vsel %vm195_vm9, %v1955_v30, %v192_v40  ;;  %415 = vmatpush.msra.mxu1 %v2493_v42  ;;  %v293_v25 = vmul.f32 0.5, %v292_v0  ;;  %v171_v63 = vand.u32 2147483648, %v2478_v32  ;;  %v169_v36 = vand.u32 2147483647, %v2478_v32  ;;  %vm2538_vm2 = vmor %vm296_vm11, %vm297_vm12 }
  0xb3   :  { %v201_v41 = vsel %vm198_vm10, %v200_v7, %v196_v43  ;;  %544 = vmatpush.msra.mxu3 %v2493_v42  ;;  %v301_v48 = vmul.f32 %v2504_v2, %v2446_v33  ;;  %vm179_vm15 = vweird.f32 %v2476_v38  ;;  %vm165_vm1 = vweird.f32 %v2478_v32 }
  0xb4   :  { %v2509_v44 = vmul.f32 %v201_v41, %v2227_v11  ;;  %1795 = vmatpush.xpose.msk.msra.mxu0 %vm31_vm0, %v2486_v60  ;;  %v294_v54 = vsub.f32 1.5, %v293_v25  ;;  %v186_v5 = vor.u32 1.1754944e-38, %v185_v52  ;;  %vm184_vm4 = vcmp.eq.f32.partialorder %v183_v58, 8.507059e+37 }
  0xb5   :  { %v1961_v45 = vpop.eup %1960  ;;  %1807 = vmatpush.xpose.msk.msra.mxu2 %vm31_vm0, %v2486_v60  ;;  %v302_v55 = vmul.f32 %v2504_v2, %v301_v48  ;;  %v172_v51 = vor.u32 1.1754944e-38, %v171_v63  ;;  %vm170_vm5 = vcmp.eq.f32.partialorder %v169_v36, 8.507059e+37  ;;  %vm306_vm6 = vweird.f32 %v2446_v33 }
  0xb6   :  { %v1963_v49 = vpop.eup %1962  ;;  %v175_v50 = vmul.f32 %v1961_v45, %v2476_v38  ;;  %416 = vmatpush.msra.mxu1 %v2509_v44  ;;  %545 = vmatpush.msra.mxu3 %v2509_v44  ;;  %vm180_vm13 = vweird.f32 %v1961_v45  ;;  %v295_v31 = vmul.f32 %v2453_v23, %v294_v54  ;;  %vm307_vm8 = vweird.f32 %v2504_v2 }
  0xb7   :  { %v161_v11 = vmul.f32 %v1963_v49, %v2478_v32  ;;  %vm166_vm14 = vweird.f32 %v1963_v49  ;;  %vm181_vm3 = vmor %vm179_vm15, %vm180_vm13  ;;  %v303_v9 = vmul.f32 0.5, %v302_v55  ;;  %vm371_vm10 = vcmask 523264  }
  0xb8   :  { %v176_v47 = vsub.f32 1.0, %v175_v50  ;;  %1796 = vmatpush.xpose.msk.msra.mxu0 %vm31_vm0, %v2493_v42  ;;  %vm167_vm7 = vmor %vm165_vm1, %vm166_vm14  ;;  %v299_v16 = vsel %vm2538_vm2, %v2453_v23, %v295_v31 }
  0xb9   :  { %v162_v53 = vsub.f32 1.0, %v161_v11  ;;  %1808 = vmatpush.xpose.msk.msra.mxu2 %vm31_vm0, %v2493_v42  ;;  %v304_v15 = vsub.f32 1.5, %v303_v9  ;;  %vm308_vm9 = vmor %vm306_vm6, %vm307_vm8 }
  0xba   :  { %v177_v56 = vmul.f32 %v1961_v45, %v176_v47 }
  0xbb   :  { %v163_v3 = vmul.f32 %v1963_v49, %v162_v53 }
  0xbc   :  { %v178_v4 = vadd.f32 %v1961_v45, %v177_v56  ;;  %1797 = vmatpush.xpose.msk.msra.mxu0 %vm31_vm0, %v2509_v44 }
  0xbd   :  { %v164_v8 = vadd.f32 %v1963_v49, %v163_v3  ;;  %1809 = vmatpush.xpose.msk.msra.mxu2 %vm31_vm0, %v2509_v44 }
  0xbe   :  { %v182_v10 = vsel %vm181_vm3, %v1961_v45, %v178_v4 }
  0xbf   :  { %v187_v12 = vsel %vm184_vm4, %v186_v5, %v182_v10  ;;  %v168_v13 = vsel %vm167_vm7, %v1963_v49, %v164_v8 }
  0xc0   :  { %v2549_v30 = vmul.f32 %v187_v12, %v2241_v18  ;;  %v173_v14 = vsel %vm170_vm5, %v172_v51, %v168_v13  ;;  %v310_v18 = vmul.f32 30.0, %v299_v16 }
  0xc1   :  { %v2555_v61 = vmul.f32 %v173_v14, %v2246_v19  ;;  %v305_v19 = vmul.f32 %v2504_v2, %v304_v15 }
  0xc2   :  { %417 = vmatpush.msra.mxu1 %v2549_v30  ;;  %546 = vmatpush.msra.mxu3 %v2549_v30  ;;  %v312_v33 = vmul.f32 %v310_v18, %v2251_v20 }
  0xc3   :  { %1798 = vmatpush.xpose.msk.msra.mxu0 %vm31_vm0, %v2549_v30  ;;  %1810 = vmatpush.xpose.msk.msra.mxu2 %vm31_vm0, %v2549_v30  ;;  %v309_v21 = vsel %vm308_vm9, %v2504_v2, %v305_v19 }
  0xc4   :  { %418 = vmatpush.msra.mxu1 %v2555_v61  ;;  %547 = vmatpush.msra.mxu3 %v2555_v61  ;;  %v311_v22 = vmul.f32 30.0, %v309_v21 }
  0xc6   :  { %1816 = vmatpush.xpose.msk.msrb.mxu1 %vm31_vm0, %v2375_v34  ;;  %669 = vmatpush.msrb.mxu3 %v2375_v34  ;;  %v313_v20 = vmul.f32 %v311_v22, %v2265_v27 }
  0xc7   :  { %1799 = vmatpush.xpose.msk.msra.mxu0 %vm31_vm0, %v2555_v61  ;;  %1811 = vmatpush.xpose.msk.msra.mxu2 %vm31_vm0, %v2555_v61 }
  0xc8   :  { %670 = vmatpush.msrb.mxu3 %v2449_v17 }
  0xca   :  { %1817 = vmatpush.xpose.msk.msrb.mxu1 %vm31_vm0, %v2449_v17  ;;  %671 = vmatpush.msrb.mxu3 %v2441_v59 }
  0xcb   :  { %1828 = vmatpush.xpose.msk.msrb.mxu0 %vm31_vm0, %v2375_v34  ;;  %798 = vmatpush.msrb.mxu2 %v2375_v34 }
  0xcc   :  { %1800 = vmatmul.msk.f32.vlgmr.msra.gmra.mxu0 %vm31_vm0, %v312_v33  ;;  %672 = vmatpush.msrb.mxu3 %v2486_v60 }
  0xcd   :  { %799 = vmatpush.msrb.mxu2 %v2449_v17 }
  0xce   :  { %1818 = vmatpush.xpose.msk.msrb.mxu1 %vm31_vm0, %v2441_v59  ;;  %673 = vmatpush.msrb.mxu3 %v2493_v42 }
  0xcf   :  { %1829 = vmatpush.xpose.msk.msrb.mxu0 %vm31_vm0, %v2449_v17  ;;  %800 = vmatpush.msrb.mxu2 %v2441_v59 }
  0xd0   :  { %674 = vmatpush.msrb.mxu3 %v2509_v44 }
  0xd1   :  { %801 = vmatpush.msrb.mxu2 %v2486_v60 }
  0xd2   :  { %1819 = vmatpush.xpose.msk.msrb.mxu1 %vm31_vm0, %v2486_v60  ;;  %675 = vmatpush.msrb.mxu3 %v2549_v30 }
  0xd3   :  { %1830 = vmatpush.xpose.msk.msrb.mxu0 %vm31_vm0, %v2441_v59  ;;  %802 = vmatpush.msrb.mxu2 %v2493_v42 }
  0xd4   :  { %1801 = vmatmul.msk.f32.gmra.mxu0 %vm31_vm0, %v313_v20  ;;  %676 = vmatpush.msrb.mxu3 %v2555_v61 }
  0xd5   :  { %803 = vmatpush.msrb.mxu2 %v2509_v44 }
  0xd6   :  { %1820 = vmatpush.xpose.msk.msrb.mxu1 %vm31_vm0, %v2493_v42 }
  0xd7   :  { %1831 = vmatpush.xpose.msk.msrb.mxu0 %vm31_vm0, %v2486_v60  ;;  %804 = vmatpush.msrb.mxu2 %v2549_v30 }
  0xd9   :  { %805 = vmatpush.msrb.mxu2 %v2555_v61 }
  0xda   :  { %1821 = vmatpush.xpose.msk.msrb.mxu1 %vm31_vm0, %v2509_v44 }
  0xdb   :  { %1832 = vmatpush.xpose.msk.msrb.mxu0 %vm31_vm0, %v2493_v42 }
  0xde   :  { %1822 = vmatpush.xpose.msk.msrb.mxu1 %vm31_vm0, %v2549_v30 }
  0xdf   :  { %1833 = vmatpush.xpose.msk.msrb.mxu0 %vm31_vm0, %v2509_v44 }
  0xe2   :  { %1823 = vmatpush.xpose.msk.msrb.mxu1 %vm31_vm0, %v2555_v61 }
  0xe3   :  { %1834 = vmatpush.xpose.msk.msrb.mxu0 %vm31_vm0, %v2549_v30 }
  0xe7   :  { %1835 = vmatpush.xpose.msk.msrb.mxu0 %vm31_vm0, %v2555_v61 }
  0xeb   :  { %1056 = vmatpush.msra.mxu0 %v2375_v34 }
  0xed   :  { %1057 = vmatpush.msra.mxu0 %v2449_v17 }
  0xef   :  { %1058 = vmatpush.msra.mxu0 %v2441_v59 }
  0xf1   :  { %1059 = vmatpush.msra.mxu0 %v2486_v60 }
  0xf3   :  { %1060 = vmatpush.msra.mxu0 %v2493_v42 }
  0xf5   :  { %1061 = vmatpush.msra.mxu0 %v2509_v44 }
  0xf7   :  { %1062 = vmatpush.msra.mxu0 %v2549_v30 }
  0xf9   :  { %1063 = vmatpush.msra.mxu0 %v2555_v61 }
 0x149   :  { %v361_v27 = vpop.f32.mrf.mxu0 }
 0x14a   :  { %v367_v23 = vmul.f32 1.442695, %v361_v27 }
 0x14c   :  { %1964 = vpow2.f32 %v367_v23 }
 0x151   :  { %v364_v1 = vpop.f32.mrf.mxu0 }
 0x152   :  { %v369_v62 = vmul.f32 1.442695, %v364_v1  ;;  %v1965_v24 = vpop.eup %1964 }
 0x153   :  { %v372_v26 = vsel %vm371_vm10, %v1965_v24, 0.0 }
 0x154   :  { %1966 = vpow2.f32 %v369_v62 }
 0x15a   :  { %v1967_v6 = vpop.eup %1966 }
 0x15b   :  { %v373_v28 = vsel %vm371_vm10, %v1967_v6, 0.0 }
 0x15c   :  { %v374_v29 = vadd.f32 %v373_v28, %v372_v26 }
 0x15e   :  { %v375_v35 = vrot.slane %v374_v29, 4 }
 0x160   :  { %v376_v38 = vadd.f32 %v375_v35, %v374_v29 }
 0x162   :  { %v377_v32 = vrot.slane %v376_v38, 2 }
 0x164   :  { %v378_v57 = vadd.f32 %v377_v32, %v376_v38 }
 0x166   :  { %v379_v46 = vrot.slane %v378_v57, 1 }
 0x168   :  { %v380_v39 = vadd.f32 %v379_v46, %v378_v57 }
 0x16a   :  { %1968 = vrcp.f32 %v380_v39  ;;  %v392_v2 = vand.u32 2147483648, %v380_v39  ;;  %v390_v41 = vand.u32 2147483647, %v380_v39  ;;  %vm386_vm12 = vweird.f32 %v380_v39 }
 0x16c   :  { %v393_v25 = vor.u32 1.1754944e-38, %v392_v2  ;;  %vm391_vm14 = vcmp.eq.f32.partialorder %v390_v41, 8.507059e+37 }
 0x170   :  { %v1969_v40 = vpop.eup %1968 }
 0x171   :  { %v382_v7 = vmul.f32 %v1969_v40, %v380_v39  ;;  %vm387_vm11 = vweird.f32 %v1969_v40 }
 0x172   :  { %vm388_vm13 = vmor %vm386_vm12, %vm387_vm11 }
 0x173   :  { %v383_v0 = vsub.f32 1.0, %v382_v7 }
 0x175   :  { %v384_v43 = vmul.f32 %v1969_v40, %v383_v0 }
 0x177   :  { %v385_v45 = vadd.f32 %v1969_v40, %v384_v43 }
 0x179   :  { %v389_v48 = vsel %vm388_vm13, %v1969_v40, %v385_v45 }
 0x17a   :  { %v394_v49 = vsel %vm391_vm14, %v393_v25, %v389_v48 }
 0x17b   :  { %v395_v50 = vmul.f32 %v1965_v24, %v394_v49  ;;  %v396_v11 = vmul.f32 %v1967_v6, %v394_v49 }
 0x17d   :  { %1802 = vmatmul.msk.f32.vlgmr.msra.gmra.mxu1 %vm371_vm10, %v395_v50  ;;  %v429_v47 = vsel %vm371_vm10, %v396_v11, 0.0  ;;  %v426_v52 = vsel %vm371_vm10, %v395_v50, 0.0 }
 0x17e   :  { %927 = vmatpush.msra.mxu1 %v2375_v34  ;;  %430 = vadd.xlane.f32.xlu2 %v429_v47 }
 0x17f   :  { %427 = vadd.xlane.f32.xlu1 %v426_v52 }
 0x180   :  { %928 = vmatpush.msra.mxu1 %v2449_v17 }
 0x182   :  { %929 = vmatpush.msra.mxu1 %v2441_v59 }
 0x184   :  { %930 = vmatpush.msra.mxu1 %v2486_v60 }
 0x185   :  { %1803 = vmatmul.msk.f32.gmra.mxu1 %vm371_vm10, %v396_v11 }
 0x186   :  { %931 = vmatpush.msra.mxu1 %v2493_v42 }
 0x188   :  { %932 = vmatpush.msra.mxu1 %v2509_v44 }
 0x18a   :  { %933 = vmatpush.msra.mxu1 %v2549_v30 }
 0x18c   :  { %934 = vmatpush.msra.mxu1 %v2555_v61 }
 0x1f1   :  { %v431_v54 = vpop.xlane.xlu2 %430 }
 0x1f2   :  { %v428_v53 = vpop.xlane.xlu1 %427 }
 0x1f3   :  { %1970 = vrcp.f32 %v428_v53 }
 0x1f4   :  { %1972 = vrcp.f32 %v431_v54 }
 0x1f9   :  { %v1971_v55 = vpop.eup %1970 }
 0x1fa   :  { %v420_v56 = vpop.f32.mrf.mxu1  ;;  %v1973_v36 = vpop.eup %1972 }
 0x1fb   :  { %v434_v58 = vmul.f32 %v1971_v55, %v420_v56 }
 0x1fd   :  { %v436_v63 = vmul.f32 %v434_v58, %v434_v58 }
 0x1ff   :  { %v438_v3 = vsel %vm31_vm0, %v436_v63, 0.0 }
 0x200   :  { %439 = vadd.xlane.f32.xlu0 %v438_v3 }
 0x202   :  { %v423_v4 = vpop.f32.mrf.mxu1 }
 0x203   :  { %v435_v37 = vmul.f32 %v1973_v36, %v423_v4 }
 0x205   :  { %v437_v5 = vmul.f32 %v435_v37, %v435_v37 }
 0x207   :  { %v441_v8 = vsel %vm31_vm0, %v437_v5, 0.0 }
 0x208   :  { %442 = vadd.xlane.f32.xlu1 %v441_v8 }
 0x273   :  { %v440_v31 = vpop.xlane.xlu0 %439 }
 0x274   :  { %1974 = vrsqrt.f32 %v440_v31  ;;  %vm450_vm1 = vweird.f32 %v440_v31 }
 0x27a   :  { %v1975_v9 = vpop.eup %1974 }
 0x27b   :  { %v445_v10 = vmul.f32 %v1975_v9, %v440_v31  ;;  %v443_v51 = vpop.xlane.xlu1 %442  ;;  %vm451_vm15 = vweird.f32 %v1975_v9 }
 0x27c   :  { %1976 = vrsqrt.f32 %v443_v51  ;;  %vm452_vm2 = vmor %vm450_vm1, %vm451_vm15  ;;  %vm460_vm4 = vweird.f32 %v443_v51 }
 0x27d   :  { %v446_v12 = vmul.f32 %v1975_v9, %v445_v10 }
 0x27f   :  { %v447_v13 = vmul.f32 0.5, %v446_v12 }
 0x281   :  { %v448_v14 = vsub.f32 1.5, %v447_v13 }
 0x282   :  { %v1977_v15 = vpop.eup %1976 }
 0x283   :  { %v449_v16 = vmul.f32 %v1975_v9, %v448_v14  ;;  %v455_v18 = vmul.f32 %v1977_v15, %v443_v51  ;;  %vm461_vm3 = vweird.f32 %v1977_v15 }
 0x284   :  { %vm462_vm7 = vmor %vm460_vm4, %vm461_vm3 }
 0x285   :  { %v456_v19 = vmul.f32 %v1977_v15, %v455_v18  ;;  %v453_v33 = vsel %vm452_vm2, %v1975_v9, %v449_v16 }
 0x286   :  { %v464_v21 = vmul.f32 30.0, %v453_v33 }
 0x287   :  { %v457_v22 = vmul.f32 0.5, %v456_v19 }
 0x288   :  { %v466_v20 = vmul.f32 %v464_v21, %v434_v58 }
 0x289   :  { %v458_v27 = vsub.f32 1.5, %v457_v22 }
 0x28a   :  { %1812 = vmatmul.msk.f32.vlgmr.msra.gmra.mxu2 %vm31_vm0, %v466_v20 }
 0x28b   :  { %v459_v23 = vmul.f32 %v1977_v15, %v458_v27  ;;  %1852 = vmatpush.xpose.msk.msra.mxu2 %vm31_vm0, %v2375_v34 }
 0x28d   :  { %v463_v1 = vsel %vm462_vm7, %v1977_v15, %v459_v23 }
 0x28e   :  { %v465_v62 = vmul.f32 30.0, %v463_v1 }
 0x28f   :  { %1853 = vmatpush.xpose.msk.msra.mxu2 %vm31_vm0, %v2449_v17 }
 0x290   :  { %v467_v24 = vmul.f32 %v465_v62, %v435_v37 }
 0x292   :  { %1813 = vmatmul.msk.f32.gmra.mxu2 %vm31_vm0, %v467_v24 }
 0x293   :  { %1854 = vmatpush.xpose.msk.msra.mxu2 %vm31_vm0, %v2441_v59 }
 0x297   :  { %1855 = vmatpush.xpose.msk.msra.mxu2 %vm31_vm0, %v2486_v60 }
 0x29b   :  { %1856 = vmatpush.xpose.msk.msra.mxu2 %vm31_vm0, %v2493_v42 }
 0x29f   :  { %1857 = vmatpush.xpose.msk.msra.mxu2 %vm31_vm0, %v2509_v44 }
 0x2a3   :  { %1858 = vmatpush.xpose.msk.msra.mxu2 %vm31_vm0, %v2549_v30 }
 0x2a7   :  { %1859 = vmatpush.xpose.msk.msra.mxu2 %vm31_vm0, %v2555_v61 }
 0x30d   :  { %v491_v6 = vpop.f32.mrf.mxu2 }
 0x30e   :  { %v497_v26 = vmul.f32 1.442695, %v491_v6 }
 0x310   :  { %1978 = vpow2.f32 %v497_v26 }
 0x315   :  { %v494_v28 = vpop.f32.mrf.mxu2 }
 0x316   :  { %v499_v29 = vmul.f32 1.442695, %v494_v28  ;;  %v1979_v35 = vpop.eup %1978 }
 0x317   :  { %v501_v32 = vsel %vm371_vm10, %v1979_v35, 0.0 }
 0x318   :  { %1980 = vpow2.f32 %v499_v29 }
 0x31e   :  { %v1981_v38 = vpop.eup %1980 }
 0x31f   :  { %v502_v57 = vsel %vm371_vm10, %v1981_v38, 0.0 }
 0x320   :  { %v503_v46 = vadd.f32 %v502_v57, %v501_v32 }
 0x322   :  { %v504_v39 = vrot.slane %v503_v46, 4 }
 0x324   :  { %v505_v40 = vadd.f32 %v504_v39, %v503_v46 }
 0x326   :  { %v506_v7 = vrot.slane %v505_v40, 2 }
 0x328   :  { %v507_v0 = vadd.f32 %v506_v7, %v505_v40 }
 0x32a   :  { %v508_v2 = vrot.slane %v507_v0, 1 }
 0x32c   :  { %v509_v43 = vadd.f32 %v508_v2, %v507_v0 }
 0x32e   :  { %1982 = vrcp.f32 %v509_v43  ;;  %v521_v48 = vand.u32 2147483648, %v509_v43  ;;  %v519_v50 = vand.u32 2147483647, %v509_v43  ;;  %vm515_vm6 = vweird.f32 %v509_v43 }
 0x330   :  { %v522_v47 = vor.u32 1.1754944e-38, %v521_v48  ;;  %vm520_vm9 = vcmp.eq.f32.partialorder %v519_v50, 8.507059e+37 }
 0x334   :  { %v1983_v41 = vpop.eup %1982 }
 0x335   :  { %v511_v45 = vmul.f32 %v1983_v41, %v509_v43  ;;  %vm516_vm5 = vweird.f32 %v1983_v41 }
 0x336   :  { %vm517_vm8 = vmor %vm515_vm6, %vm516_vm5 }
 0x337   :  { %v512_v25 = vsub.f32 1.0, %v511_v45 }
 0x339   :  { %v513_v49 = vmul.f32 %v1983_v41, %v512_v25 }
 0x33b   :  { %v514_v11 = vadd.f32 %v1983_v41, %v513_v49 }
 0x33d   :  { %v518_v52 = vsel %vm517_vm8, %v1983_v41, %v514_v11 }
 0x33e   :  { %v523_v53 = vsel %vm520_vm9, %v522_v47, %v518_v52 }
 0x33f   :  { %v524_v54 = vmul.f32 %v1979_v35, %v523_v53  ;;  %v525_v55 = vmul.f32 %v1981_v38, %v523_v53 }
 0x341   :  { %1814 = vmatmul.msk.f32.vlgmr.msra.gmra.mxu3 %vm371_vm10, %v524_v54  ;;  %v558_v56 = vsel %vm371_vm10, %v525_v55, 0.0  ;;  %v555_v58 = vsel %vm371_vm10, %v524_v54, 0.0 }
 0x342   :  { %1840 = vmatpush.xpose.msk.msra.mxu3 %vm31_vm0, %v2375_v34  ;;  %559 = vadd.xlane.f32.xlu0 %v558_v56 }
 0x343   :  { %556 = vadd.xlane.f32.xlu2 %v555_v58 }
 0x346   :  { %1841 = vmatpush.xpose.msk.msra.mxu3 %vm31_vm0, %v2449_v17 }
 0x349   :  { %1815 = vmatmul.msk.f32.gmra.mxu3 %vm371_vm10, %v525_v55 }
 0x34a   :  { %1842 = vmatpush.xpose.msk.msra.mxu3 %vm31_vm0, %v2441_v59 }
 0x34e   :  { %1843 = vmatpush.xpose.msk.msra.mxu3 %vm31_vm0, %v2486_v60 }
 0x352   :  { %1844 = vmatpush.xpose.msk.msra.mxu3 %vm31_vm0, %v2493_v42 }
 0x356   :  { %1845 = vmatpush.xpose.msk.msra.mxu3 %vm31_vm0, %v2509_v44 }
 0x35a   :  { %1846 = vmatpush.xpose.msk.msra.mxu3 %vm31_vm0, %v2549_v30 }
 0x35e   :  { %1847 = vmatpush.xpose.msk.msra.mxu3 %vm31_vm0, %v2555_v61 }
 0x3b5   :  { %v560_v3 = vpop.xlane.xlu0 %559 }
 0x3b6   :  { %v557_v63 = vpop.xlane.xlu2 %556 }
 0x3b7   :  { %1984 = vrcp.f32 %v557_v63 }
 0x3b8   :  { %1986 = vrcp.f32 %v560_v3 }
 0x3bd   :  { %v1985_v36 = vpop.eup %1984 }
 0x3be   :  { %v1987_v31 = vpop.eup %1986 }
 0x3c4   :  { %v549_v4 = vpop.f32.mrf.mxu3 }
 0x3c5   :  { %v563_v37 = vmul.f32 %v1985_v36, %v549_v4 }
 0x3c7   :  { %v565_v5 = vmul.f32 %v563_v37, %v563_v37 }
 0x3c9   :  { %v567_v8 = vsel %vm31_vm0, %v565_v5, 0.0 }
 0x3ca   :  { %568 = vadd.xlane.f32.xlu1 %v567_v8 }
 0x3cc   :  { %v552_v9 = vpop.f32.mrf.mxu3 }
 0x3cd   :  { %v564_v10 = vmul.f32 %v1987_v31, %v552_v9 }
 0x3cf   :  { %v566_v51 = vmul.f32 %v564_v10, %v564_v10 }
 0x3d1   :  { %v570_v12 = vsel %vm31_vm0, %v566_v51, 0.0 }
 0x3d2   :  { %571 = vadd.xlane.f32.xlu2 %v570_v12 }
 0x43d   :  { %v569_v13 = vpop.xlane.xlu1 %568 }
 0x43e   :  { %1988 = vrsqrt.f32 %v569_v13  ;;  %vm579_vm12 = vweird.f32 %v569_v13 }
 0x444   :  { %v1989_v14 = vpop.eup %1988 }
 0x445   :  { %v574_v15 = vmul.f32 %v1989_v14, %v569_v13  ;;  %v572_v16 = vpop.xlane.xlu2 %571  ;;  %vm580_vm11 = vweird.f32 %v1989_v14 }
 0x446   :  { %1990 = vrsqrt.f32 %v572_v16  ;;  %vm581_vm13 = vmor %vm579_vm12, %vm580_vm11  ;;  %vm589_vm15 = vweird.f32 %v572_v16 }
 0x447   :  { %v575_v18 = vmul.f32 %v1989_v14, %v574_v15 }
 0x449   :  { %v576_v19 = vmul.f32 0.5, %v575_v18 }
 0x44b   :  { %v577_v33 = vsub.f32 1.5, %v576_v19 }
 0x44c   :  { %v1991_v21 = vpop.eup %1990 }
 0x44d   :  { %v578_v22 = vmul.f32 %v1989_v14, %v577_v33  ;;  %v584_v20 = vmul.f32 %v1991_v21, %v572_v16  ;;  %vm590_vm14 = vweird.f32 %v1991_v21 }
 0x44e   :  { %vm591_vm1 = vmor %vm589_vm15, %vm590_vm14 }
 0x44f   :  { %v582_v27 = vsel %vm581_vm13, %v1989_v14, %v578_v22  ;;  %v585_v23 = vmul.f32 %v1991_v21, %v584_v20 }
 0x450   :  { %v593_v1 = vmul.f32 30.0, %v582_v27 }
 0x451   :  { %v586_v62 = vmul.f32 0.5, %v585_v23 }
 0x452   :  { %v595_v24 = vmul.f32 %v593_v1, %v563_v37 }
 0x453   :  { %v587_v6 = vsub.f32 1.5, %v586_v62 }
 0x454   :  { %1824 = vmatmul.msk.f32.vlgmr.msrb.gmra.mxu1 %vm31_vm0, %v595_v24 }
 0x455   :  { %v588_v26 = vmul.f32 %v1991_v21, %v587_v6  ;;  %1864 = vmatpush.xpose.msk.msrb.mxu1 %vm31_vm0, %v2375_v34 }
 0x457   :  { %v592_v28 = vsel %vm591_vm1, %v1991_v21, %v588_v26 }
 0x458   :  { %v594_v29 = vmul.f32 30.0, %v592_v28 }
 0x459   :  { %1865 = vmatpush.xpose.msk.msrb.mxu1 %vm31_vm0, %v2449_v17 }
 0x45a   :  { %v596_v35 = vmul.f32 %v594_v29, %v564_v10 }
 0x45c   :  { %1825 = vmatmul.msk.f32.gmra.mxu1 %vm31_vm0, %v596_v35 }
 0x45d   :  { %1866 = vmatpush.xpose.msk.msrb.mxu1 %vm31_vm0, %v2441_v59 }
 0x461   :  { %1867 = vmatpush.xpose.msk.msrb.mxu1 %vm31_vm0, %v2486_v60 }
 0x465   :  { %1868 = vmatpush.xpose.msk.msrb.mxu1 %vm31_vm0, %v2493_v42 }
 0x469   :  { %1869 = vmatpush.xpose.msk.msrb.mxu1 %vm31_vm0, %v2509_v44 }
 0x46d   :  { %1870 = vmatpush.xpose.msk.msrb.mxu1 %vm31_vm0, %v2549_v30 }
 0x471   :  { %1871 = vmatpush.xpose.msk.msrb.mxu1 %vm31_vm0, %v2555_v61 }
 0x4d1   :  { %v620_v38 = vpop.f32.mrf.mxu1 }
 0x4d2   :  { %v626_v32 = vmul.f32 1.442695, %v620_v38 }
 0x4d4   :  { %1992 = vpow2.f32 %v626_v32 }
 0x4d9   :  { %v623_v57 = vpop.f32.mrf.mxu1 }
 0x4da   :  { %v628_v46 = vmul.f32 1.442695, %v623_v57  ;;  %v1993_v39 = vpop.eup %1992 }
 0x4db   :  { %v630_v7 = vsel %vm371_vm10, %v1993_v39, 0.0 }
 0x4dc   :  { %1994 = vpow2.f32 %v628_v46 }
 0x4e2   :  { %v1995_v40 = vpop.eup %1994 }
 0x4e3   :  { %v631_v0 = vsel %vm371_vm10, %v1995_v40, 0.0 }
 0x4e4   :  { %v632_v2 = vadd.f32 %v631_v0, %v630_v7 }
 0x4e6   :  { %v633_v43 = vrot.slane %v632_v2, 4 }
 0x4e8   :  { %v634_v41 = vadd.f32 %v633_v43, %v632_v2 }
 0x4ea   :  { %v635_v45 = vrot.slane %v634_v41, 2 }
 0x4ec   :  { %v636_v25 = vadd.f32 %v635_v45, %v634_v41 }
 0x4ee   :  { %v637_v48 = vrot.slane %v636_v25, 1 }
 0x4f0   :  { %v638_v49 = vadd.f32 %v637_v48, %v636_v25 }
 0x4f2   :  { %1996 = vrcp.f32 %v638_v49  ;;  %v650_v52 = vand.u32 2147483648, %v638_v49  ;;  %v648_v54 = vand.u32 2147483647, %v638_v49  ;;  %vm644_vm3 = vweird.f32 %v638_v49 }
 0x4f4   :  { %v651_v56 = vor.u32 1.1754944e-38, %v650_v52  ;;  %vm649_vm7 = vcmp.eq.f32.partialorder %v648_v54, 8.507059e+37 }
 0x4f8   :  { %v1997_v50 = vpop.eup %1996 }
 0x4f9   :  { %v640_v11 = vmul.f32 %v1997_v50, %v638_v49  ;;  %vm645_vm2 = vweird.f32 %v1997_v50 }
 0x4fa   :  { %vm646_vm4 = vmor %vm644_vm3, %vm645_vm2 }
 0x4fb   :  { %v641_v47 = vsub.f32 1.0, %v640_v11 }
 0x4fd   :  { %v642_v53 = vmul.f32 %v1997_v50, %v641_v47 }
 0x4ff   :  { %v643_v55 = vadd.f32 %v1997_v50, %v642_v53 }
 0x501   :  { %v647_v58 = vsel %vm646_vm4, %v1997_v50, %v643_v55 }
 0x502   :  { %v652_v63 = vsel %vm649_vm7, %v651_v56, %v647_v58 }
 0x503   :  { %v653_v3 = vmul.f32 %v1993_v39, %v652_v63  ;;  %v654_v36 = vmul.f32 %v1995_v40, %v652_v63 }
 0x505   :  { %1826 = vmatmul.msk.f32.vlgmr.msrb.gmra.mxu3 %vm371_vm10, %v653_v3  ;;  %v687_v4 = vsel %vm371_vm10, %v654_v36, 0.0  ;;  %v684_v37 = vsel %vm371_vm10, %v653_v3, 0.0 }
 0x506   :  { %1185 = vmatpush.msrb.mxu3 %v2375_v34  ;;  %688 = vadd.xlane.f32.xlu1 %v687_v4 }
 0x507   :  { %685 = vadd.xlane.f32.xlu0 %v684_v37 }
 0x508   :  { %1186 = vmatpush.msrb.mxu3 %v2449_v17 }
 0x50a   :  { %1187 = vmatpush.msrb.mxu3 %v2441_v59 }
 0x50c   :  { %1188 = vmatpush.msrb.mxu3 %v2486_v60 }
 0x50d   :  { %1827 = vmatmul.msk.f32.gmra.mxu3 %vm371_vm10, %v654_v36 }
 0x50e   :  { %1189 = vmatpush.msrb.mxu3 %v2493_v42 }
 0x510   :  { %1190 = vmatpush.msrb.mxu3 %v2509_v44 }
 0x512   :  { %1191 = vmatpush.msrb.mxu3 %v2549_v30 }
 0x514   :  { %1192 = vmatpush.msrb.mxu3 %v2555_v61 }
 0x579   :  { %v689_v8 = vpop.xlane.xlu1 %688 }
 0x57a   :  { %v686_v5 = vpop.xlane.xlu0 %685 }
 0x57b   :  { %1998 = vrcp.f32 %v686_v5 }
 0x57c   :  { %2000 = vrcp.f32 %v689_v8 }
 0x581   :  { %v1999_v31 = vpop.eup %1998 }
 0x582   :  { %v2001_v13 = vpop.eup %2000 }
 0x588   :  { %v678_v9 = vpop.f32.mrf.mxu3 }
 0x589   :  { %v692_v10 = vmul.f32 %v1999_v31, %v678_v9 }
 0x58b   :  { %v694_v51 = vmul.f32 %v692_v10, %v692_v10 }
 0x58d   :  { %v696_v12 = vsel %vm31_vm0, %v694_v51, 0.0 }
 0x58e   :  { %697 = vadd.xlane.f32.xlu2 %v696_v12 }
 0x590   :  { %v681_v14 = vpop.f32.mrf.mxu3 }
 0x591   :  { %v693_v15 = vmul.f32 %v2001_v13, %v681_v14 }
 0x593   :  { %v695_v16 = vmul.f32 %v693_v15, %v693_v15 }
 0x595   :  { %v699_v18 = vsel %vm31_vm0, %v695_v16, 0.0 }
 0x596   :  { %700 = vadd.xlane.f32.xlu0 %v699_v18 }
 0x601   :  { %v698_v19 = vpop.xlane.xlu2 %697 }
 0x602   :  { %2002 = vrsqrt.f32 %v698_v19  ;;  %vm708_vm6 = vweird.f32 %v698_v19 }
 0x608   :  { %v2003_v33 = vpop.eup %2002 }
 0x609   :  { %v703_v21 = vmul.f32 %v2003_v33, %v698_v19  ;;  %v701_v22 = vpop.xlane.xlu0 %700  ;;  %vm709_vm5 = vweird.f32 %v2003_v33 }
 0x60a   :  { %2004 = vrsqrt.f32 %v701_v22  ;;  %vm710_vm8 = vmor %vm708_vm6, %vm709_vm5  ;;  %vm718_vm11 = vweird.f32 %v701_v22 }
 0x60b   :  { %v704_v20 = vmul.f32 %v2003_v33, %v703_v21 }
 0x60d   :  { %v705_v27 = vmul.f32 0.5, %v704_v20 }
 0x60f   :  { %v706_v23 = vsub.f32 1.5, %v705_v27 }
 0x610   :  { %v2005_v1 = vpop.eup %2004 }
 0x611   :  { %v707_v62 = vmul.f32 %v2003_v33, %v706_v23  ;;  %v713_v24 = vmul.f32 %v2005_v1, %v701_v22  ;;  %vm719_vm9 = vweird.f32 %v2005_v1 }
 0x612   :  { %vm720_vm12 = vmor %vm718_vm11, %vm719_vm9 }
 0x613   :  { %v711_v6 = vsel %vm710_vm8, %v2003_v33, %v707_v62  ;;  %v714_v26 = vmul.f32 %v2005_v1, %v713_v24 }
 0x614   :  { %v722_v28 = vmul.f32 30.0, %v711_v6 }
 0x615   :  { %v715_v29 = vmul.f32 0.5, %v714_v26 }
 0x616   :  { %v724_v35 = vmul.f32 %v722_v28, %v692_v10 }
 0x617   :  { %v716_v38 = vsub.f32 1.5, %v715_v29 }
 0x618   :  { %1836 = vmatmul.msk.f32.vlgmr.msrb.gmra.mxu0 %vm31_vm0, %v724_v35 }
 0x619   :  { %v717_v32 = vmul.f32 %v2005_v1, %v716_v38  ;;  %1876 = vmatpush.xpose.msk.msrb.mxu0 %vm31_vm0, %v2375_v34 }
 0x61b   :  { %v721_v57 = vsel %vm720_vm12, %v2005_v1, %v717_v32 }
 0x61c   :  { %v723_v46 = vmul.f32 30.0, %v721_v57 }
 0x61d   :  { %1877 = vmatpush.xpose.msk.msrb.mxu0 %vm31_vm0, %v2449_v17 }
 0x61e   :  { %v725_v39 = vmul.f32 %v723_v46, %v693_v15 }
 0x620   :  { %1837 = vmatmul.msk.f32.gmra.mxu0 %vm31_vm0, %v725_v39 }
 0x621   :  { %1878 = vmatpush.xpose.msk.msrb.mxu0 %vm31_vm0, %v2441_v59 }
 0x625   :  { %1879 = vmatpush.xpose.msk.msrb.mxu0 %vm31_vm0, %v2486_v60 }
 0x629   :  { %1880 = vmatpush.xpose.msk.msrb.mxu0 %vm31_vm0, %v2493_v42 }
 0x62d   :  { %1881 = vmatpush.xpose.msk.msrb.mxu0 %vm31_vm0, %v2509_v44 }
 0x631   :  { %1882 = vmatpush.xpose.msk.msrb.mxu0 %vm31_vm0, %v2549_v30 }
 0x635   :  { %1883 = vmatpush.xpose.msk.msrb.mxu0 %vm31_vm0, %v2555_v61 }
 0x695   :  { %v749_v40 = vpop.f32.mrf.mxu0 }
 0x696   :  { %v755_v7 = vmul.f32 1.442695, %v749_v40 }
 0x698   :  { %2006 = vpow2.f32 %v755_v7 }
 0x69d   :  { %v752_v0 = vpop.f32.mrf.mxu0 }
 0x69e   :  { %v757_v2 = vmul.f32 1.442695, %v752_v0  ;;  %v2007_v43 = vpop.eup %2006 }
 0x69f   :  { %v759_v45 = vsel %vm371_vm10, %v2007_v43, 0.0 }
 0x6a0   :  { %2008 = vpow2.f32 %v757_v2 }
 0x6a6   :  { %v2009_v41 = vpop.eup %2008 }
 0x6a7   :  { %v760_v25 = vsel %vm371_vm10, %v2009_v41, 0.0 }
 0x6a8   :  { %v761_v48 = vadd.f32 %v760_v25, %v759_v45 }
 0x6aa   :  { %v762_v49 = vrot.slane %v761_v48, 4 }
 0x6ac   :  { %v763_v50 = vadd.f32 %v762_v49, %v761_v48 }
 0x6ae   :  { %v764_v11 = vrot.slane %v763_v50, 2 }
 0x6b0   :  { %v765_v47 = vadd.f32 %v764_v11, %v763_v50 }
 0x6b2   :  { %v766_v52 = vrot.slane %v765_v47, 1 }
 0x6b4   :  { %v767_v53 = vadd.f32 %v766_v52, %v765_v47 }
 0x6b6   :  { %2010 = vrcp.f32 %v767_v53  ;;  %v779_v58 = vand.u32 2147483648, %v767_v53  ;;  %v777_v3 = vand.u32 2147483647, %v767_v53  ;;  %vm773_vm14 = vweird.f32 %v767_v53 }
 0x6b8   :  { %v780_v4 = vor.u32 1.1754944e-38, %v779_v58  ;;  %vm778_vm1 = vcmp.eq.f32.partialorder %v777_v3, 8.507059e+37 }
 0x6bc   :  { %v2011_v54 = vpop.eup %2010 }
 0x6bd   :  { %v769_v55 = vmul.f32 %v2011_v54, %v767_v53  ;;  %vm774_vm13 = vweird.f32 %v2011_v54 }
 0x6be   :  { %vm775_vm15 = vmor %vm773_vm14, %vm774_vm13 }
 0x6bf   :  { %v770_v56 = vsub.f32 1.0, %v769_v55 }
 0x6c1   :  { %v771_v63 = vmul.f32 %v2011_v54, %v770_v56 }
 0x6c3   :  { %v772_v36 = vadd.f32 %v2011_v54, %v771_v63 }
 0x6c5   :  { %v776_v37 = vsel %vm775_vm15, %v2011_v54, %v772_v36 }
 0x6c6   :  { %v781_v5 = vsel %vm778_vm1, %v780_v4, %v776_v37 }
 0x6c7   :  { %v782_v8 = vmul.f32 %v2007_v43, %v781_v5  ;;  %v783_v31 = vmul.f32 %v2009_v41, %v781_v5 }
 0x6c9   :  { %1838 = vmatmul.msk.f32.vlgmr.msrb.gmra.mxu2 %vm371_vm10, %v782_v8  ;;  %v816_v9 = vsel %vm371_vm10, %v783_v31, 0.0  ;;  %v813_v10 = vsel %vm371_vm10, %v782_v8, 0.0 }
 0x6ca   :  { %1314 = vmatpush.msrb.mxu2 %v2375_v34  ;;  %817 = vadd.xlane.f32.xlu2 %v816_v9 }
 0x6cb   :  { %814 = vadd.xlane.f32.xlu1 %v813_v10 }
 0x6cc   :  { %1315 = vmatpush.msrb.mxu2 %v2449_v17 }
 0x6ce   :  { %1316 = vmatpush.msrb.mxu2 %v2441_v59 }
 0x6d0   :  { %1317 = vmatpush.msrb.mxu2 %v2486_v60 }
 0x6d1   :  { %1839 = vmatmul.msk.f32.gmra.mxu2 %vm371_vm10, %v783_v31 }
 0x6d2   :  { %1318 = vmatpush.msrb.mxu2 %v2493_v42 }
 0x6d4   :  { %1319 = vmatpush.msrb.mxu2 %v2509_v44 }
 0x6d6   :  { %1320 = vmatpush.msrb.mxu2 %v2549_v30 }
 0x6d8   :  { %1321 = vmatpush.msrb.mxu2 %v2555_v61 }
 0x73d   :  { %v818_v12 = vpop.xlane.xlu2 %817 }
 0x73e   :  { %v815_v51 = vpop.xlane.xlu1 %814 }
 0x73f   :  { %2012 = vrcp.f32 %v815_v51 }
 0x740   :  { %2014 = vrcp.f32 %v818_v12 }
 0x745   :  { %v2013_v13 = vpop.eup %2012 }
 0x746   :  { %v2015_v19 = vpop.eup %2014 }
 0x74c   :  { %v807_v14 = vpop.f32.mrf.mxu2 }
 0x74d   :  { %v821_v15 = vmul.f32 %v2013_v13, %v807_v14 }
 0x74f   :  { %v823_v16 = vmul.f32 %v821_v15, %v821_v15 }
 0x751   :  { %v825_v18 = vsel %vm31_vm0, %v823_v16, 0.0 }
 0x752   :  { %826 = vadd.xlane.f32.xlu0 %v825_v18 }
 0x754   :  { %v810_v33 = vpop.f32.mrf.mxu2 }
 0x755   :  { %v822_v21 = vmul.f32 %v2015_v19, %v810_v33 }
 0x757   :  { %v824_v22 = vmul.f32 %v822_v21, %v822_v21 }
 0x759   :  { %v828_v20 = vsel %vm31_vm0, %v824_v22, 0.0 }
 0x75a   :  { %829 = vadd.xlane.f32.xlu1 %v828_v20 }
 0x7c5   :  { %v827_v27 = vpop.xlane.xlu0 %826 }
 0x7c6   :  { %2016 = vrsqrt.f32 %v827_v27  ;;  %vm837_vm3 = vweird.f32 %v827_v27 }
 0x7cc   :  { %v2017_v23 = vpop.eup %2016 }
 0x7cd   :  { %v832_v1 = vmul.f32 %v2017_v23, %v827_v27  ;;  %v830_v62 = vpop.xlane.xlu1 %829  ;;  %vm838_vm2 = vweird.f32 %v2017_v23 }
 0x7ce   :  { %2018 = vrsqrt.f32 %v830_v62  ;;  %vm839_vm4 = vmor %vm837_vm3, %vm838_vm2  ;;  %vm847_vm5 = vweird.f32 %v830_v62 }
 0x7cf   :  { %v833_v24 = vmul.f32 %v2017_v23, %v832_v1 }
 0x7d1   :  { %v834_v6 = vmul.f32 0.5, %v833_v24 }
 0x7d3   :  { %v835_v26 = vsub.f32 1.5, %v834_v6 }
 0x7d4   :  { %v2019_v28 = vpop.eup %2018 }
 0x7d5   :  { %v836_v29 = vmul.f32 %v2017_v23, %v835_v26  ;;  %v842_v35 = vmul.f32 %v2019_v28, %v830_v62  ;;  %vm848_vm7 = vweird.f32 %v2019_v28 }
 0x7d6   :  { %vm849_vm6 = vmor %vm847_vm5, %vm848_vm7 }
 0x7d7   :  { %v840_v38 = vsel %vm839_vm4, %v2017_v23, %v836_v29  ;;  %v843_v32 = vmul.f32 %v2019_v28, %v842_v35 }
 0x7d8   :  { %v851_v57 = vmul.f32 30.0, %v840_v38 }
 0x7d9   :  { %v844_v46 = vmul.f32 0.5, %v843_v32 }
 0x7da   :  { %v853_v39 = vmul.f32 %v851_v57, %v821_v15 }
 0x7db   :  { %v845_v40 = vsub.f32 1.5, %v844_v46 }
 0x7dc   :  { %1848 = vmatmul.msk.f32.vlgmr.msra.gmra.mxu3 %vm31_vm0, %v853_v39 }
 0x7dd   :  { %v846_v7 = vmul.f32 %v2019_v28, %v845_v40  ;;  %1888 = vmatpush.xpose.msk.msra.mxu3 %vm31_vm0, %v2375_v34 }
 0x7df   :  { %v850_v0 = vsel %vm849_vm6, %v2019_v28, %v846_v7 }
 0x7e0   :  { %v852_v2 = vmul.f32 30.0, %v850_v0 }
 0x7e1   :  { %1889 = vmatpush.xpose.msk.msra.mxu3 %vm31_vm0, %v2449_v17 }
 0x7e2   :  { %v854_v43 = vmul.f32 %v852_v2, %v822_v21 }
 0x7e4   :  { %1849 = vmatmul.msk.f32.gmra.mxu3 %vm31_vm0, %v854_v43 }
 0x7e5   :  { %1890 = vmatpush.xpose.msk.msra.mxu3 %vm31_vm0, %v2441_v59 }
 0x7e9   :  { %1891 = vmatpush.xpose.msk.msra.mxu3 %vm31_vm0, %v2486_v60 }
 0x7ed   :  { %1892 = vmatpush.xpose.msk.msra.mxu3 %vm31_vm0, %v2493_v42 }
 0x7f1   :  { %1893 = vmatpush.xpose.msk.msra.mxu3 %vm31_vm0, %v2509_v44 }
 0x7f5   :  { %1894 = vmatpush.xpose.msk.msra.mxu3 %vm31_vm0, %v2549_v30 }
 0x7f9   :  { %1895 = vmatpush.xpose.msk.msra.mxu3 %vm31_vm0, %v2555_v61 }
 0x85f   :  { %v878_v41 = vpop.f32.mrf.mxu3 }
 0x860   :  { %v884_v45 = vmul.f32 1.442695, %v878_v41 }
 0x862   :  { %2020 = vpow2.f32 %v884_v45 }
 0x867   :  { %v881_v25 = vpop.f32.mrf.mxu3 }
 0x868   :  { %v886_v48 = vmul.f32 1.442695, %v881_v25  ;;  %v2021_v49 = vpop.eup %2020 }
 0x869   :  { %v888_v11 = vsel %vm371_vm10, %v2021_v49, 0.0 }
 0x86a   :  { %2022 = vpow2.f32 %v886_v48 }
 0x870   :  { %v2023_v50 = vpop.eup %2022 }
 0x871   :  { %v889_v47 = vsel %vm371_vm10, %v2023_v50, 0.0 }
 0x872   :  { %v890_v52 = vadd.f32 %v889_v47, %v888_v11 }
 0x874   :  { %v891_v53 = vrot.slane %v890_v52, 4 }
 0x876   :  { %v892_v54 = vadd.f32 %v891_v53, %v890_v52 }
 0x878   :  { %v893_v55 = vrot.slane %v892_v54, 2 }
 0x87a   :  { %v894_v56 = vadd.f32 %v893_v55, %v892_v54 }
 0x87c   :  { %v895_v58 = vrot.slane %v894_v56, 1 }
 0x87e   :  { %v896_v63 = vadd.f32 %v895_v58, %v894_v56 }
 0x880   :  { %2024 = vrcp.f32 %v896_v63  ;;  %v908_v37 = vand.u32 2147483648, %v896_v63  ;;  %v906_v8 = vand.u32 2147483647, %v896_v63  ;;  %vm902_vm9 = vweird.f32 %v896_v63 }
 0x882   :  { %v909_v9 = vor.u32 1.1754944e-38, %v908_v37  ;;  %vm907_vm12 = vcmp.eq.f32.partialorder %v906_v8, 8.507059e+37 }
 0x886   :  { %v2025_v3 = vpop.eup %2024 }
 0x887   :  { %v898_v36 = vmul.f32 %v2025_v3, %v896_v63  ;;  %vm903_vm8 = vweird.f32 %v2025_v3 }
 0x888   :  { %vm904_vm11 = vmor %vm902_vm9, %vm903_vm8 }
 0x889   :  { %v899_v4 = vsub.f32 1.0, %v898_v36 }
 0x88b   :  { %v900_v5 = vmul.f32 %v2025_v3, %v899_v4 }
 0x88d   :  { %v901_v31 = vadd.f32 %v2025_v3, %v900_v5 }
 0x88f   :  { %v905_v10 = vsel %vm904_vm11, %v2025_v3, %v901_v31 }
 0x890   :  { %v910_v51 = vsel %vm907_vm12, %v909_v9, %v905_v10 }
 0x891   :  { %v911_v12 = vmul.f32 %v2021_v49, %v910_v51  ;;  %v912_v13 = vmul.f32 %v2023_v50, %v910_v51 }
 0x893   :  { %1850 = vmatmul.msk.f32.vlgmr.msra.gmra.mxu1 %vm371_vm10, %v911_v12  ;;  %v945_v14 = vsel %vm371_vm10, %v912_v13, 0.0  ;;  %v942_v15 = vsel %vm371_vm10, %v911_v12, 0.0 }
 0x894   :  { %1443 = vmatpush.msra.mxu1 %v2375_v34  ;;  %946 = vadd.xlane.f32.xlu0 %v945_v14 }
 0x895   :  { %943 = vadd.xlane.f32.xlu2 %v942_v15 }
 0x896   :  { %1444 = vmatpush.msra.mxu1 %v2449_v17 }
 0x898   :  { %1445 = vmatpush.msra.mxu1 %v2441_v59 }
 0x89a   :  { %1446 = vmatpush.msra.mxu1 %v2486_v60 }
 0x89b   :  { %1851 = vmatmul.msk.f32.gmra.mxu1 %vm371_vm10, %v912_v13 }
 0x89c   :  { %1447 = vmatpush.msra.mxu1 %v2493_v42 }
 0x89e   :  { %1448 = vmatpush.msra.mxu1 %v2509_v44 }
 0x8a0   :  { %1449 = vmatpush.msra.mxu1 %v2549_v30 }
 0x8a2   :  { %1450 = vmatpush.msra.mxu1 %v2555_v61 }
 0x907   :  { %v947_v18 = vpop.xlane.xlu0 %946 }
 0x908   :  { %v944_v16 = vpop.xlane.xlu2 %943 }
 0x909   :  { %2026 = vrcp.f32 %v944_v16 }
 0x90a   :  { %2028 = vrcp.f32 %v947_v18 }
 0x90f   :  { %v2027_v19 = vpop.eup %2026 }
 0x910   :  { %v936_v33 = vpop.f32.mrf.mxu1  ;;  %v2029_v27 = vpop.eup %2028 }
 0x911   :  { %v950_v21 = vmul.f32 %v2027_v19, %v936_v33 }
 0x913   :  { %v952_v22 = vmul.f32 %v950_v21, %v950_v21 }
 0x915   :  { %v954_v20 = vsel %vm31_vm0, %v952_v22, 0.0 }
 0x916   :  { %955 = vadd.xlane.f32.xlu1 %v954_v20 }
 0x918   :  { %v939_v23 = vpop.f32.mrf.mxu1 }
 0x919   :  { %v951_v1 = vmul.f32 %v2029_v27, %v939_v23 }
 0x91b   :  { %v953_v62 = vmul.f32 %v951_v1, %v951_v1 }
 0x91d   :  { %v957_v24 = vsel %vm31_vm0, %v953_v62, 0.0 }
 0x91e   :  { %958 = vadd.xlane.f32.xlu2 %v957_v24 }
 0x989   :  { %v956_v6 = vpop.xlane.xlu1 %955 }
 0x98a   :  { %2030 = vrsqrt.f32 %v956_v6  ;;  %vm966_vm14 = vweird.f32 %v956_v6 }
 0x990   :  { %v2031_v26 = vpop.eup %2030 }
 0x991   :  { %v961_v28 = vmul.f32 %v2031_v26, %v956_v6  ;;  %v959_v29 = vpop.xlane.xlu2 %958  ;;  %vm967_vm13 = vweird.f32 %v2031_v26 }
 0x992   :  { %2032 = vrsqrt.f32 %v959_v29  ;;  %vm968_vm15 = vmor %vm966_vm14, %vm967_vm13  ;;  %vm976_vm2 = vweird.f32 %v959_v29 }
 0x993   :  { %v962_v35 = vmul.f32 %v2031_v26, %v961_v28 }
 0x995   :  { %v963_v38 = vmul.f32 0.5, %v962_v35 }
 0x997   :  { %v964_v32 = vsub.f32 1.5, %v963_v38 }
 0x998   :  { %v2033_v57 = vpop.eup %2032 }
 0x999   :  { %v965_v46 = vmul.f32 %v2031_v26, %v964_v32  ;;  %v971_v39 = vmul.f32 %v2033_v57, %v959_v29  ;;  %vm977_vm1 = vweird.f32 %v2033_v57 }
 0x99a   :  { %vm978_vm3 = vmor %vm976_vm2, %vm977_vm1 }
 0x99b   :  { %v969_v40 = vsel %vm968_vm15, %v2031_v26, %v965_v46  ;;  %v972_v7 = vmul.f32 %v2033_v57, %v971_v39 }
 0x99c   :  { %v980_v0 = vmul.f32 30.0, %v969_v40 }
 0x99d   :  { %v973_v2 = vmul.f32 0.5, %v972_v7 }
 0x99e   :  { %v982_v43 = vmul.f32 %v980_v0, %v950_v21 }
 0x99f   :  { %v974_v41 = vsub.f32 1.5, %v973_v2 }
 0x9a0   :  { %1860 = vmatmul.msk.f32.vlgmr.msra.gmra.mxu2 %vm31_vm0, %v982_v43 }
 0x9a1   :  { %v975_v45 = vmul.f32 %v2033_v57, %v974_v41  ;;  %1900 = vmatpush.xpose.msk.msra.mxu2 %vm31_vm0, %v2375_v34 }
 0x9a3   :  { %v979_v25 = vsel %vm978_vm3, %v2033_v57, %v975_v45 }
 0x9a4   :  { %v981_v48 = vmul.f32 30.0, %v979_v25 }
 0x9a5   :  { %1901 = vmatpush.xpose.msk.msra.mxu2 %vm31_vm0, %v2449_v17 }
 0x9a6   :  { %v983_v49 = vmul.f32 %v981_v48, %v951_v1 }
 0x9a8   :  { %1861 = vmatmul.msk.f32.gmra.mxu2 %vm31_vm0, %v983_v49 }
 0x9a9   :  { %1902 = vmatpush.xpose.msk.msra.mxu2 %vm31_vm0, %v2441_v59 }
 0x9ad   :  { %1903 = vmatpush.xpose.msk.msra.mxu2 %vm31_vm0, %v2486_v60 }
 0x9b1   :  { %1904 = vmatpush.xpose.msk.msra.mxu2 %vm31_vm0, %v2493_v42 }
 0x9b5   :  { %1905 = vmatpush.xpose.msk.msra.mxu2 %vm31_vm0, %v2509_v44 }
 0x9b9   :  { %1906 = vmatpush.xpose.msk.msra.mxu2 %vm31_vm0, %v2549_v30 }
 0x9bd   :  { %1907 = vmatpush.xpose.msk.msra.mxu2 %vm31_vm0, %v2555_v61 }
 0xa23   :  { %v1007_v50 = vpop.f32.mrf.mxu2 }
 0xa24   :  { %v1013_v11 = vmul.f32 1.442695, %v1007_v50 }
 0xa26   :  { %2034 = vpow2.f32 %v1013_v11 }
 0xa2b   :  { %v1010_v47 = vpop.f32.mrf.mxu2 }
 0xa2c   :  { %v1015_v52 = vmul.f32 1.442695, %v1010_v47  ;;  %v2035_v53 = vpop.eup %2034 }
 0xa2d   :  { %v1017_v55 = vsel %vm371_vm10, %v2035_v53, 0.0 }
 0xa2e   :  { %2036 = vpow2.f32 %v1015_v52 }
 0xa34   :  { %v2037_v54 = vpop.eup %2036 }
 0xa35   :  { %v1018_v56 = vsel %vm371_vm10, %v2037_v54, 0.0 }
 0xa36   :  { %v1019_v58 = vadd.f32 %v1018_v56, %v1017_v55 }
 0xa38   :  { %v1020_v63 = vrot.slane %v1019_v58, 4 }
 0xa3a   :  { %v1021_v3 = vadd.f32 %v1020_v63, %v1019_v58 }
 0xa3c   :  { %v1022_v36 = vrot.slane %v1021_v3, 2 }
 0xa3e   :  { %v1023_v4 = vadd.f32 %v1022_v36, %v1021_v3 }
 0xa40   :  { %v1024_v37 = vrot.slane %v1023_v4, 1 }
 0xa42   :  { %v1025_v5 = vadd.f32 %v1024_v37, %v1023_v4 }
 0xa44   :  { %2038 = vrcp.f32 %v1025_v5  ;;  %v1037_v10 = vand.u32 2147483648, %v1025_v5  ;;  %v1035_v12 = vand.u32 2147483647, %v1025_v5  ;;  %vm1031_vm7 = vweird.f32 %v1025_v5 }
 0xa46   :  { %v1038_v14 = vor.u32 1.1754944e-38, %v1037_v10  ;;  %vm1036_vm6 = vcmp.eq.f32.partialorder %v1035_v12, 8.507059e+37 }
 0xa4a   :  { %v2039_v8 = vpop.eup %2038 }
 0xa4b   :  { %v1027_v31 = vmul.f32 %v2039_v8, %v1025_v5  ;;  %vm1032_vm4 = vweird.f32 %v2039_v8 }
 0xa4c   :  { %vm1033_vm5 = vmor %vm1031_vm7, %vm1032_vm4 }
 0xa4d   :  { %v1028_v9 = vsub.f32 1.0, %v1027_v31 }
 0xa4f   :  { %v1029_v51 = vmul.f32 %v2039_v8, %v1028_v9 }
 0xa51   :  { %v1030_v13 = vadd.f32 %v2039_v8, %v1029_v51 }
 0xa53   :  { %v1034_v15 = vsel %vm1033_vm5, %v2039_v8, %v1030_v13 }
 0xa54   :  { %v1039_v16 = vsel %vm1036_vm6, %v1038_v14, %v1034_v15 }
 0xa55   :  { %v1040_v18 = vmul.f32 %v2035_v53, %v1039_v16  ;;  %v1041_v19 = vmul.f32 %v2037_v54, %v1039_v16 }
 0xa57   :  { %1862 = vmatmul.msk.f32.vlgmr.msra.gmra.mxu0 %vm371_vm10, %v1040_v18  ;;  %v1074_v33 = vsel %vm371_vm10, %v1041_v19, 0.0  ;;  %v1071_v21 = vsel %vm371_vm10, %v1040_v18, 0.0 }
 0xa58   :  { %1572 = vmatpush.msra.mxu0 %v2375_v34  ;;  %1075 = vadd.xlane.f32.xlu1 %v1074_v33 }
 0xa59   :  { %1072 = vadd.xlane.f32.xlu0 %v1071_v21 }
 0xa5a   :  { %1573 = vmatpush.msra.mxu0 %v2449_v17 }
 0xa5c   :  { %1574 = vmatpush.msra.mxu0 %v2441_v59 }
 0xa5e   :  { %1575 = vmatpush.msra.mxu0 %v2486_v60 }
 0xa5f   :  { %1863 = vmatmul.msk.f32.gmra.mxu0 %vm371_vm10, %v1041_v19 }
 0xa60   :  { %1576 = vmatpush.msra.mxu0 %v2493_v42 }
 0xa62   :  { %1577 = vmatpush.msra.mxu0 %v2509_v44 }
 0xa64   :  { %1578 = vmatpush.msra.mxu0 %v2549_v30 }
 0xa66   :  { %1579 = vmatpush.msra.mxu0 %v2555_v61 }
 0xacb   :  { %v1076_v20 = vpop.xlane.xlu1 %1075 }
 0xacc   :  { %v1073_v22 = vpop.xlane.xlu0 %1072 }
 0xacd   :  { %2040 = vrcp.f32 %v1073_v22 }
 0xace   :  { %2042 = vrcp.f32 %v1076_v20 }
 0xad3   :  { %v2041_v27 = vpop.eup %2040 }
 0xad4   :  { %v1065_v23 = vpop.f32.mrf.mxu0  ;;  %v2043_v6 = vpop.eup %2042 }
 0xad5   :  { %v1079_v1 = vmul.f32 %v2041_v27, %v1065_v23 }
 0xad7   :  { %v1081_v62 = vmul.f32 %v1079_v1, %v1079_v1 }
 0xad9   :  { %v1083_v24 = vsel %vm31_vm0, %v1081_v62, 0.0 }
 0xada   :  { %1084 = vadd.xlane.f32.xlu2 %v1083_v24 }
 0xadc   :  { %v1068_v26 = vpop.f32.mrf.mxu0 }
 0xadd   :  { %v1080_v28 = vmul.f32 %v2043_v6, %v1068_v26 }
 0xadf   :  { %v1082_v29 = vmul.f32 %v1080_v28, %v1080_v28 }
 0xae1   :  { %v1086_v35 = vsel %vm31_vm0, %v1082_v29, 0.0 }
 0xae2   :  { %1087 = vadd.xlane.f32.xlu0 %v1086_v35 }
 0xb4d   :  { %v1085_v38 = vpop.xlane.xlu2 %1084 }
 0xb4e   :  { %2044 = vrsqrt.f32 %v1085_v38  ;;  %vm1095_vm9 = vweird.f32 %v1085_v38 }
 0xb54   :  { %v2045_v32 = vpop.eup %2044 }
 0xb55   :  { %v1090_v57 = vmul.f32 %v2045_v32, %v1085_v38  ;;  %v1088_v46 = vpop.xlane.xlu0 %1087  ;;  %vm1096_vm8 = vweird.f32 %v2045_v32 }
 0xb56   :  { %2046 = vrsqrt.f32 %v1088_v46  ;;  %vm1097_vm11 = vmor %vm1095_vm9, %vm1096_vm8  ;;  %vm1105_vm13 = vweird.f32 %v1088_v46 }
 0xb57   :  { %v1091_v39 = vmul.f32 %v2045_v32, %v1090_v57 }
 0xb59   :  { %v1092_v40 = vmul.f32 0.5, %v1091_v39 }
 0xb5b   :  { %v1093_v7 = vsub.f32 1.5, %v1092_v40 }
 0xb5c   :  { %v2047_v0 = vpop.eup %2046 }
 0xb5d   :  { %v1094_v2 = vmul.f32 %v2045_v32, %v1093_v7  ;;  %v1100_v43 = vmul.f32 %v2047_v0, %v1088_v46  ;;  %vm1106_vm12 = vweird.f32 %v2047_v0 }
 0xb5e   :  { %vm1107_vm14 = vmor %vm1105_vm13, %vm1106_vm12 }
 0xb5f   :  { %v1098_v41 = vsel %vm1097_vm11, %v2045_v32, %v1094_v2  ;;  %v1101_v45 = vmul.f32 %v2047_v0, %v1100_v43 }
 0xb60   :  { %v1109_v25 = vmul.f32 30.0, %v1098_v41 }
 0xb61   :  { %v1102_v48 = vmul.f32 0.5, %v1101_v45 }
 0xb62   :  { %v1111_v49 = vmul.f32 %v1109_v25, %v1079_v1 }
 0xb63   :  { %v1103_v50 = vsub.f32 1.5, %v1102_v48 }
 0xb64   :  { %1872 = vmatmul.msk.f32.vlgmr.msrb.gmra.mxu1 %vm31_vm0, %v1111_v49 }
 0xb65   :  { %v1104_v11 = vmul.f32 %v2047_v0, %v1103_v50  ;;  %1912 = vmatpush.xpose.msk.msrb.mxu1 %vm31_vm0, %v2375_v34 }
 0xb67   :  { %v1108_v47 = vsel %vm1107_vm14, %v2047_v0, %v1104_v11 }
 0xb68   :  { %v1110_v52 = vmul.f32 30.0, %v1108_v47 }
 0xb69   :  { %1913 = vmatpush.xpose.msk.msrb.mxu1 %vm31_vm0, %v2449_v17 }
 0xb6a   :  { %v1112_v53 = vmul.f32 %v1110_v52, %v1080_v28 }
 0xb6c   :  { %1873 = vmatmul.msk.f32.gmra.mxu1 %vm31_vm0, %v1112_v53 }
 0xb6d   :  { %1914 = vmatpush.xpose.msk.msrb.mxu1 %vm31_vm0, %v2441_v59 }
 0xb71   :  { %1915 = vmatpush.xpose.msk.msrb.mxu1 %vm31_vm0, %v2486_v60 }
 0xb75   :  { %1916 = vmatpush.xpose.msk.msrb.mxu1 %vm31_vm0, %v2493_v42 }
 0xb79   :  { %1917 = vmatpush.xpose.msk.msrb.mxu1 %vm31_vm0, %v2509_v44 }
 0xb7d   :  { %1918 = vmatpush.xpose.msk.msrb.mxu1 %vm31_vm0, %v2549_v30 }
 0xb81   :  { %1919 = vmatpush.xpose.msk.msrb.mxu1 %vm31_vm0, %v2555_v61 }
 0xbe1   :  { %v1136_v54 = vpop.f32.mrf.mxu1 }
 0xbe2   :  { %v1142_v55 = vmul.f32 1.442695, %v1136_v54 }
 0xbe4   :  { %2048 = vpow2.f32 %v1142_v55 }
 0xbe9   :  { %v1139_v56 = vpop.f32.mrf.mxu1 }
 0xbea   :  { %v1144_v58 = vmul.f32 1.442695, %v1139_v56  ;;  %v2049_v63 = vpop.eup %2048 }
 0xbeb   :  { %v1146_v36 = vsel %vm371_vm10, %v2049_v63, 0.0 }
 0xbec   :  { %2050 = vpow2.f32 %v1144_v58 }
 0xbf2   :  { %v2051_v3 = vpop.eup %2050 }
 0xbf3   :  { %v1147_v4 = vsel %vm371_vm10, %v2051_v3, 0.0 }
 0xbf4   :  { %v1148_v37 = vadd.f32 %v1147_v4, %v1146_v36 }
 0xbf6   :  { %v1149_v5 = vrot.slane %v1148_v37, 4 }
 0xbf8   :  { %v1150_v8 = vadd.f32 %v1149_v5, %v1148_v37 }
 0xbfa   :  { %v1151_v31 = vrot.slane %v1150_v8, 2 }
 0xbfc   :  { %v1152_v9 = vadd.f32 %v1151_v31, %v1150_v8 }
 0xbfe   :  { %v1153_v10 = vrot.slane %v1152_v9, 1 }
 0xc00   :  { %v1154_v51 = vadd.f32 %v1153_v10, %v1152_v9 }
 0xc02   :  { %2052 = vrcp.f32 %v1154_v51  ;;  %v1166_v15 = vand.u32 2147483648, %v1154_v51  ;;  %v1164_v18 = vand.u32 2147483647, %v1154_v51  ;;  %vm1160_vm1 = vweird.f32 %v1154_v51 }
 0xc04   :  { %v1167_v33 = vor.u32 1.1754944e-38, %v1166_v15  ;;  %vm1165_vm3 = vcmp.eq.f32.partialorder %v1164_v18, 8.507059e+37 }
 0xc08   :  { %v2053_v12 = vpop.eup %2052 }
 0xc09   :  { %v1156_v13 = vmul.f32 %v2053_v12, %v1154_v51  ;;  %vm1161_vm15 = vweird.f32 %v2053_v12 }
 0xc0a   :  { %vm1162_vm2 = vmor %vm1160_vm1, %vm1161_vm15 }
 0xc0b   :  { %v1157_v14 = vsub.f32 1.0, %v1156_v13 }
 0xc0d   :  { %v1158_v16 = vmul.f32 %v2053_v12, %v1157_v14 }
 0xc0f   :  { %v1159_v19 = vadd.f32 %v2053_v12, %v1158_v16 }
 0xc11   :  { %v1163_v21 = vsel %vm1162_vm2, %v2053_v12, %v1159_v19 }
 0xc12   :  { %v1168_v22 = vsel %vm1165_vm3, %v1167_v33, %v1163_v21 }
 0xc13   :  { %v1169_v20 = vmul.f32 %v2049_v63, %v1168_v22  ;;  %v1170_v27 = vmul.f32 %v2051_v3, %v1168_v22 }
 0xc15   :  { %1874 = vmatmul.msk.f32.vlgmr.msrb.gmra.mxu3 %vm371_vm10, %v1169_v20  ;;  %v1203_v23 = vsel %vm371_vm10, %v1170_v27, 0.0  ;;  %v1200_v1 = vsel %vm371_vm10, %v1169_v20, 0.0 }
 0xc16   :  { %1701 = vmatpush.msrb.mxu3 %v2375_v34  ;;  %1204 = vadd.xlane.f32.xlu2 %v1203_v23 }
 0xc17   :  { %1201 = vadd.xlane.f32.xlu1 %v1200_v1 }
 0xc18   :  { %1702 = vmatpush.msrb.mxu3 %v2449_v17 }
 0xc1a   :  { %1703 = vmatpush.msrb.mxu3 %v2441_v59 }
 0xc1c   :  { %1704 = vmatpush.msrb.mxu3 %v2486_v60 }
 0xc1d   :  { %1875 = vmatmul.msk.f32.gmra.mxu3 %vm371_vm10, %v1170_v27 }
 0xc1e   :  { %1705 = vmatpush.msrb.mxu3 %v2493_v42 }
 0xc20   :  { %1706 = vmatpush.msrb.mxu3 %v2509_v44 }
 0xc22   :  { %1707 = vmatpush.msrb.mxu3 %v2549_v30 }
 0xc24   :  { %1708 = vmatpush.msrb.mxu3 %v2555_v61 }
 0xc89   :  { %v1205_v34 = vpop.xlane.xlu2 %1204 }
 0xc8a   :  { %v1202_v62 = vpop.xlane.xlu1 %1201 }
 0xc8b   :  { %2054 = vrcp.f32 %v1202_v62 }
 0xc8c   :  { %2056 = vrcp.f32 %v1205_v34 }
 0xc91   :  { %v2055_v24 = vpop.eup %2054 }
 0xc92   :  { %v2057_v26 = vpop.eup %2056 }
 0xc98   :  { %v1194_v6 = vpop.f32.mrf.mxu3 }
 0xc99   :  { %v1208_v17 = vmul.f32 %v2055_v24, %v1194_v6 }
 0xc9b   :  { %v1210_v59 = vmul.f32 %v1208_v17, %v1208_v17 }
 0xc9d   :  { %v1212_v60 = vsel %vm31_vm0, %v1210_v59, 0.0 }
 0xc9e   :  { %1213 = vadd.xlane.f32.xlu0 %v1212_v60 }
 0xca0   :  { %v1197_v28 = vpop.f32.mrf.mxu3 }
 0xca1   :  { %v1209_v42 = vmul.f32 %v2057_v26, %v1197_v28 }
 0xca3   :  { %v1211_v29 = vmul.f32 %v1209_v42, %v1209_v42 }
 0xca5   :  { %v1215_v44 = vsel %vm31_vm0, %v1211_v29, 0.0 }
 0xca6   :  { %1216 = vadd.xlane.f32.xlu1 %v1215_v44 }
 0xd11   :  { %v1214_v30 = vpop.xlane.xlu0 %1213 }
 0xd12   :  { %2058 = vrsqrt.f32 %v1214_v30  ;;  %vm1224_vm7 = vweird.f32 %v1214_v30 }
 0xd18   :  { %v2059_v61 = vpop.eup %2058 }
 0xd19   :  { %v1219_v35 = vmul.f32 %v2059_v61, %v1214_v30  ;;  %v1217_v38 = vpop.xlane.xlu1 %1216  ;;  %vm1225_vm4 = vweird.f32 %v2059_v61 }
 0xd1a   :  { %2060 = vrsqrt.f32 %v1217_v38  ;;  %vm1226_vm5 = vmor %vm1224_vm7, %vm1225_vm4  ;;  %vm1234_vm8 = vweird.f32 %v1217_v38 }
 0xd1b   :  { %v1220_v32 = vmul.f32 %v2059_v61, %v1219_v35 }
 0xd1d   :  { %v1221_v57 = vmul.f32 0.5, %v1220_v32 }
 0xd1f   :  { %v1222_v46 = vsub.f32 1.5, %v1221_v57 }
 0xd20   :  { %v2061_v39 = vpop.eup %2060 }
 0xd21   :  { %v1223_v40 = vmul.f32 %v2059_v61, %v1222_v46  ;;  %v1229_v7 = vmul.f32 %v2061_v39, %v1217_v38  ;;  %vm1235_vm6 = vweird.f32 %v2061_v39 }
 0xd22   :  { %vm1236_vm9 = vmor %vm1234_vm8, %vm1235_vm6 }
 0xd23   :  { %v1227_v0 = vsel %vm1226_vm5, %v2059_v61, %v1223_v40  ;;  %v1230_v2 = vmul.f32 %v2061_v39, %v1229_v7 }
 0xd24   :  { %v1238_v43 = vmul.f32 30.0, %v1227_v0 }
 0xd25   :  { %v1231_v41 = vmul.f32 0.5, %v1230_v2 }
 0xd26   :  { %v1240_v45 = vmul.f32 %v1238_v43, %v1208_v17 }
 0xd27   :  { %v1232_v25 = vsub.f32 1.5, %v1231_v41 }
 0xd28   :  { %1884 = vmatmul.msk.f32.vlgmr.msrb.gmra.mxu0 %vm31_vm0, %v1240_v45 }
 0xd29   :  { %v1233_v48 = vmul.f32 %v2061_v39, %v1232_v25 }
 0xd2b   :  { %v1237_v49 = vsel %vm1236_vm9, %v2061_v39, %v1233_v48 }
 0xd2c   :  { %v1239_v50 = vmul.f32 30.0, %v1237_v49 }
 0xd2e   :  { %v1241_v11 = vmul.f32 %v1239_v50, %v1209_v42 }
 0xd30   :  { %1885 = vmatmul.msk.f32.gmra.mxu0 %vm31_vm0, %v1241_v11 }
 0xda5   :  { %v1265_v47 = vpop.f32.mrf.mxu0 }
 0xda6   :  { %v1271_v52 = vmul.f32 1.442695, %v1265_v47 }
 0xda8   :  { %2062 = vpow2.f32 %v1271_v52 }
 0xdad   :  { %v1268_v53 = vpop.f32.mrf.mxu0 }
 0xdae   :  { %v1273_v54 = vmul.f32 1.442695, %v1268_v53  ;;  %v2063_v55 = vpop.eup %2062 }
 0xdaf   :  { %v1275_v58 = vsel %vm371_vm10, %v2063_v55, 0.0 }
 0xdb0   :  { %2064 = vpow2.f32 %v1273_v54 }
 0xdb6   :  { %v2065_v56 = vpop.eup %2064 }
 0xdb7   :  { %v1276_v63 = vsel %vm371_vm10, %v2065_v56, 0.0 }
 0xdb8   :  { %v1277_v3 = vadd.f32 %v1276_v63, %v1275_v58 }
 0xdba   :  { %v1278_v36 = vrot.slane %v1277_v3, 4 }
 0xdbc   :  { %v1279_v4 = vadd.f32 %v1278_v36, %v1277_v3 }
 0xdbe   :  { %v1280_v37 = vrot.slane %v1279_v4, 2 }
 0xdc0   :  { %v1281_v5 = vadd.f32 %v1280_v37, %v1279_v4 }
 0xdc2   :  { %v1282_v8 = vrot.slane %v1281_v5, 1 }
 0xdc4   :  { %v1283_v31 = vadd.f32 %v1282_v8, %v1281_v5 }
 0xdc6   :  { %2066 = vrcp.f32 %v1283_v31  ;;  %v1295_v12 = vand.u32 2147483648, %v1283_v31  ;;  %v1293_v14 = vand.u32 2147483647, %v1283_v31  ;;  %vm1289_vm12 = vweird.f32 %v1283_v31 }
 0xdc8   :  { %v1296_v16 = vor.u32 1.1754944e-38, %v1295_v12  ;;  %vm1294_vm14 = vcmp.eq.f32.partialorder %v1293_v14, 8.507059e+37 }
 0xdcc   :  { %v2067_v9 = vpop.eup %2066 }
 0xdcd   :  { %v1285_v10 = vmul.f32 %v2067_v9, %v1283_v31  ;;  %vm1290_vm11 = vweird.f32 %v2067_v9 }
 0xdce   :  { %vm1291_vm13 = vmor %vm1289_vm12, %vm1290_vm11 }
 0xdcf   :  { %v1286_v51 = vsub.f32 1.0, %v1285_v10 }
 0xdd1   :  { %v1287_v13 = vmul.f32 %v2067_v9, %v1286_v51 }
 0xdd3   :  { %v1288_v15 = vadd.f32 %v2067_v9, %v1287_v13 }
 0xdd5   :  { %v1292_v18 = vsel %vm1291_vm13, %v2067_v9, %v1288_v15 }
 0xdd6   :  { %v1297_v19 = vsel %vm1294_vm14, %v1296_v16, %v1292_v18 }
 0xdd7   :  { %v1298_v33 = vmul.f32 %v2063_v55, %v1297_v19  ;;  %v1299_v21 = vmul.f32 %v2065_v56, %v1297_v19 }
 0xdd9   :  { %1886 = vmatmul.msk.f32.vlgmr.msrb.gmra.mxu2 %vm371_vm10, %v1298_v33  ;;  %v1332_v22 = vsel %vm371_vm10, %v1299_v21, 0.0  ;;  %v1329_v20 = vsel %vm371_vm10, %v1298_v33, 0.0 }
 0xdda   :  { %1333 = vadd.xlane.f32.xlu0 %v1332_v22  ;;  %1330 = vadd.xlane.f32.xlu2 %v1329_v20 }
 0xde1   :  { %1887 = vmatmul.msk.f32.gmra.mxu2 %vm371_vm10, %v1299_v21 }
 0xe4d   :  { %v1331_v27 = vpop.xlane.xlu2 %1330  ;;  %v1334_v23 = vpop.xlane.xlu0 %1333 }
 0xe4e   :  { %2068 = vrcp.f32 %v1331_v27 }
 0xe4f   :  { %2070 = vrcp.f32 %v1334_v23 }
 0xe54   :  { %v2069_v1 = vpop.eup %2068 }
 0xe55   :  { %v2071_v17 = vpop.eup %2070 }
 0xe5c   :  { %v1323_v62 = vpop.f32.mrf.mxu2 }
 0xe5d   :  { %v1337_v34 = vmul.f32 %v2069_v1, %v1323_v62 }
 0xe5f   :  { %v1339_v24 = vmul.f32 %v1337_v34, %v1337_v34 }
 0xe61   :  { %v1341_v6 = vsel %vm31_vm0, %v1339_v24, 0.0 }
 0xe62   :  { %1342 = vadd.xlane.f32.xlu1 %v1341_v6 }
 0xe64   :  { %v1326_v59 = vpop.f32.mrf.mxu2 }
 0xe65   :  { %v1338_v60 = vmul.f32 %v2071_v17, %v1326_v59 }
 0xe67   :  { %v1340_v26 = vmul.f32 %v1338_v60, %v1338_v60 }
 0xe69   :  { %v1344_v28 = vsel %vm31_vm0, %v1340_v26, 0.0 }
 0xe6a   :  { %1345 = vadd.xlane.f32.xlu2 %v1344_v28 }
 0xed5   :  { %v1343_v42 = vpop.xlane.xlu1 %1342 }
 0xed6   :  { %2072 = vrsqrt.f32 %v1343_v42  ;;  %vm1353_vm1 = vweird.f32 %v1343_v42 }
 0xedc   :  { %v2073_v29 = vpop.eup %2072 }
 0xedd   :  { %v1348_v44 = vmul.f32 %v2073_v29, %v1343_v42  ;;  %v1346_v30 = vpop.xlane.xlu2 %1345  ;;  %vm1354_vm15 = vweird.f32 %v2073_v29 }
 0xede   :  { %2074 = vrsqrt.f32 %v1346_v30  ;;  %vm1355_vm2 = vmor %vm1353_vm1, %vm1354_vm15  ;;  %vm1363_vm4 = vweird.f32 %v1346_v30 }
 0xedf   :  { %v1349_v61 = vmul.f32 %v2073_v29, %v1348_v44 }
 0xee1   :  { %v1350_v35 = vmul.f32 0.5, %v1349_v61 }
 0xee3   :  { %v1351_v38 = vsub.f32 1.5, %v1350_v35 }
 0xee4   :  { %v2075_v32 = vpop.eup %2074 }
 0xee5   :  { %v1352_v57 = vmul.f32 %v2073_v29, %v1351_v38  ;;  %v1358_v46 = vmul.f32 %v2075_v32, %v1346_v30  ;;  %vm1364_vm3 = vweird.f32 %v2075_v32 }
 0xee6   :  { %vm1365_vm7 = vmor %vm1363_vm4, %vm1364_vm3 }
 0xee7   :  { %v1356_v39 = vsel %vm1355_vm2, %v2073_v29, %v1352_v57  ;;  %v1359_v40 = vmul.f32 %v2075_v32, %v1358_v46 }
 0xee8   :  { %v1367_v7 = vmul.f32 30.0, %v1356_v39 }
 0xee9   :  { %v1360_v0 = vmul.f32 0.5, %v1359_v40 }
 0xeea   :  { %v1369_v2 = vmul.f32 %v1367_v7, %v1337_v34 }
 0xeeb   :  { %v1361_v43 = vsub.f32 1.5, %v1360_v0 }
 0xeec   :  { %1896 = vmatmul.msk.f32.vlgmr.msra.gmra.mxu3 %vm31_vm0, %v1369_v2 }
 0xeed   :  { %v1362_v41 = vmul.f32 %v2075_v32, %v1361_v43 }
 0xeef   :  { %v1366_v45 = vsel %vm1365_vm7, %v2075_v32, %v1362_v41 }
 0xef0   :  { %v1368_v25 = vmul.f32 30.0, %v1366_v45 }
 0xef2   :  { %v1370_v48 = vmul.f32 %v1368_v25, %v1338_v60 }
 0xef4   :  { %1897 = vmatmul.msk.f32.gmra.mxu3 %vm31_vm0, %v1370_v48 }
 0xf6f   :  { %v1394_v49 = vpop.f32.mrf.mxu3 }
 0xf70   :  { %v1400_v50 = vmul.f32 1.442695, %v1394_v49 }
 0xf72   :  { %2076 = vpow2.f32 %v1400_v50 }
 0xf77   :  { %v1397_v11 = vpop.f32.mrf.mxu3 }
 0xf78   :  { %v1402_v47 = vmul.f32 1.442695, %v1397_v11  ;;  %v2077_v52 = vpop.eup %2076 }
 0xf79   :  { %v1404_v54 = vsel %vm371_vm10, %v2077_v52, 0.0 }
 0xf7a   :  { %2078 = vpow2.f32 %v1402_v47 }
 0xf80   :  { %v2079_v53 = vpop.eup %2078 }
 0xf81   :  { %v1405_v55 = vsel %vm371_vm10, %v2079_v53, 0.0 }
 0xf82   :  { %v1406_v56 = vadd.f32 %v1405_v55, %v1404_v54 }
 0xf84   :  { %v1407_v58 = vrot.slane %v1406_v56, 4 }
 0xf86   :  { %v1408_v63 = vadd.f32 %v1407_v58, %v1406_v56 }
 0xf88   :  { %v1409_v3 = vrot.slane %v1408_v63, 2 }
 0xf8a   :  { %v1410_v36 = vadd.f32 %v1409_v3, %v1408_v63 }
 0xf8c   :  { %v1411_v4 = vrot.slane %v1410_v36, 1 }
 0xf8e   :  { %v1412_v37 = vadd.f32 %v1411_v4, %v1410_v36 }
 0xf90   :  { %2080 = vrcp.f32 %v1412_v37  ;;  %v1424_v9 = vand.u32 2147483648, %v1412_v37  ;;  %v1422_v51 = vand.u32 2147483647, %v1412_v37  ;;  %vm1418_vm6 = vweird.f32 %v1412_v37 }
 0xf92   :  { %v1425_v13 = vor.u32 1.1754944e-38, %v1424_v9  ;;  %vm1423_vm9 = vcmp.eq.f32.partialorder %v1422_v51, 8.507059e+37 }
 0xf96   :  { %v2081_v5 = vpop.eup %2080 }
 0xf97   :  { %v1414_v8 = vmul.f32 %v2081_v5, %v1412_v37  ;;  %vm1419_vm5 = vweird.f32 %v2081_v5 }
 0xf98   :  { %vm1420_vm8 = vmor %vm1418_vm6, %vm1419_vm5 }
 0xf99   :  { %v1415_v31 = vsub.f32 1.0, %v1414_v8 }
 0xf9b   :  { %v1416_v10 = vmul.f32 %v2081_v5, %v1415_v31 }
 0xf9d   :  { %v1417_v12 = vadd.f32 %v2081_v5, %v1416_v10 }
 0xf9f   :  { %v1421_v14 = vsel %vm1420_vm8, %v2081_v5, %v1417_v12 }
 0xfa0   :  { %v1426_v15 = vsel %vm1423_vm9, %v1425_v13, %v1421_v14 }
 0xfa1   :  { %v1427_v16 = vmul.f32 %v2077_v52, %v1426_v15  ;;  %v1428_v18 = vmul.f32 %v2079_v53, %v1426_v15 }
 0xfa3   :  { %1898 = vmatmul.msk.f32.vlgmr.msra.gmra.mxu1 %vm371_vm10, %v1427_v16  ;;  %v1461_v19 = vsel %vm371_vm10, %v1428_v18, 0.0  ;;  %v1458_v33 = vsel %vm371_vm10, %v1427_v16, 0.0 }
 0xfa4   :  { %1462 = vadd.xlane.f32.xlu1 %v1461_v19  ;;  %1459 = vadd.xlane.f32.xlu0 %v1458_v33 }
 0xfab   :  { %1899 = vmatmul.msk.f32.gmra.mxu1 %vm371_vm10, %v1428_v18 }
0x1017   :  { %v1460_v21 = vpop.xlane.xlu0 %1459  ;;  %v1463_v22 = vpop.xlane.xlu1 %1462 }
0x1018   :  { %2082 = vrcp.f32 %v1460_v21 }
0x1019   :  { %2084 = vrcp.f32 %v1463_v22 }
0x101e   :  { %v2083_v20 = vpop.eup %2082 }
0x101f   :  { %v2085_v34 = vpop.eup %2084 }
0x1020   :  { %v1452_v27 = vpop.f32.mrf.mxu1 }
0x1021   :  { %v1466_v23 = vmul.f32 %v2083_v20, %v1452_v27 }
0x1023   :  { %v1468_v1 = vmul.f32 %v1466_v23, %v1466_v23 }
0x1025   :  { %v1470_v62 = vsel %vm31_vm0, %v1468_v1, 0.0 }
0x1026   :  { %1471 = vadd.xlane.f32.xlu2 %v1470_v62 }
0x1028   :  { %v1455_v24 = vpop.f32.mrf.mxu1 }
0x1029   :  { %v1467_v6 = vmul.f32 %v2085_v34, %v1455_v24 }
0x102b   :  { %v1469_v17 = vmul.f32 %v1467_v6, %v1467_v6 }
0x102d   :  { %v1473_v59 = vsel %vm31_vm0, %v1469_v17, 0.0 }
0x102e   :  { %1474 = vadd.xlane.f32.xlu0 %v1473_v59 }
0x1099   :  { %v1472_v60 = vpop.xlane.xlu2 %1471 }
0x109a   :  { %2086 = vrsqrt.f32 %v1472_v60  ;;  %vm1482_vm12 = vweird.f32 %v1472_v60 }
0x10a0   :  { %v2087_v26 = vpop.eup %2086 }
0x10a1   :  { %v1477_v28 = vmul.f32 %v2087_v26, %v1472_v60  ;;  %v1475_v42 = vpop.xlane.xlu0 %1474  ;;  %vm1483_vm11 = vweird.f32 %v2087_v26 }
0x10a2   :  { %2088 = vrsqrt.f32 %v1475_v42  ;;  %vm1484_vm13 = vmor %vm1482_vm12, %vm1483_vm11  ;;  %vm1492_vm15 = vweird.f32 %v1475_v42 }
0x10a3   :  { %v1478_v29 = vmul.f32 %v2087_v26, %v1477_v28 }
0x10a5   :  { %v1479_v44 = vmul.f32 0.5, %v1478_v29 }
0x10a7   :  { %v1480_v30 = vsub.f32 1.5, %v1479_v44 }
0x10a8   :  { %v2089_v61 = vpop.eup %2088 }
0x10a9   :  { %v1481_v35 = vmul.f32 %v2087_v26, %v1480_v30  ;;  %v1487_v38 = vmul.f32 %v2089_v61, %v1475_v42  ;;  %vm1493_vm14 = vweird.f32 %v2089_v61 }
0x10aa   :  { %vm1494_vm1 = vmor %vm1492_vm15, %vm1493_vm14 }
0x10ab   :  { %v1485_v32 = vsel %vm1484_vm13, %v2087_v26, %v1481_v35  ;;  %v1488_v57 = vmul.f32 %v2089_v61, %v1487_v38 }
0x10ac   :  { %v1496_v46 = vmul.f32 30.0, %v1485_v32 }
0x10ad   :  { %v1489_v39 = vmul.f32 0.5, %v1488_v57 }
0x10ae   :  { %v1498_v40 = vmul.f32 %v1496_v46, %v1466_v23 }
0x10af   :  { %v1490_v7 = vsub.f32 1.5, %v1489_v39 }
0x10b0   :  { %1908 = vmatmul.msk.f32.vlgmr.msra.gmra.mxu2 %vm31_vm0, %v1498_v40 }
0x10b1   :  { %v1491_v0 = vmul.f32 %v2089_v61, %v1490_v7 }
0x10b3   :  { %v1495_v2 = vsel %vm1494_vm1, %v2089_v61, %v1491_v0 }
0x10b4   :  { %v1497_v43 = vmul.f32 30.0, %v1495_v2 }
0x10b6   :  { %v1499_v41 = vmul.f32 %v1497_v43, %v1467_v6 }
0x10b8   :  { %1909 = vmatmul.msk.f32.gmra.mxu2 %vm31_vm0, %v1499_v41 }
0x1133   :  { %v1523_v45 = vpop.f32.mrf.mxu2 }
0x1134   :  { %v1529_v25 = vmul.f32 1.442695, %v1523_v45 }
0x1136   :  { %2090 = vpow2.f32 %v1529_v25 }
0x113b   :  { %v1526_v48 = vpop.f32.mrf.mxu2 }
0x113c   :  { %v1531_v49 = vmul.f32 1.442695, %v1526_v48  ;;  %v2091_v50 = vpop.eup %2090 }
0x113d   :  { %v1533_v47 = vsel %vm371_vm10, %v2091_v50, 0.0 }
0x113e   :  { %2092 = vpow2.f32 %v1531_v49 }
0x1144   :  { %v2093_v11 = vpop.eup %2092 }
0x1145   :  { %v1534_v52 = vsel %vm371_vm10, %v2093_v11, 0.0 }
0x1146   :  { %v1535_v53 = vadd.f32 %v1534_v52, %v1533_v47 }
0x1148   :  { %v1536_v54 = vrot.slane %v1535_v53, 4 }
0x114a   :  { %v1537_v55 = vadd.f32 %v1536_v54, %v1535_v53 }
0x114c   :  { %v1538_v56 = vrot.slane %v1537_v55, 2 }
0x114e   :  { %v1539_v58 = vadd.f32 %v1538_v56, %v1537_v55 }
0x1150   :  { %v1540_v63 = vrot.slane %v1539_v58, 1 }
0x1152   :  { %v1541_v3 = vadd.f32 %v1540_v63, %v1539_v58 }
0x1154   :  { %2094 = vrcp.f32 %v1541_v3  ;;  %v1553_v5 = vand.u32 2147483648, %v1541_v3  ;;  %v1551_v31 = vand.u32 2147483647, %v1541_v3  ;;  %vm1547_vm3 = vweird.f32 %v1541_v3 }
0x1156   :  { %v1554_v10 = vor.u32 1.1754944e-38, %v1553_v5  ;;  %vm1552_vm7 = vcmp.eq.f32.partialorder %v1551_v31, 8.507059e+37 }
0x115a   :  { %v2095_v36 = vpop.eup %2094 }
0x115b   :  { %v1543_v4 = vmul.f32 %v2095_v36, %v1541_v3  ;;  %vm1548_vm2 = vweird.f32 %v2095_v36 }
0x115c   :  { %vm1549_vm4 = vmor %vm1547_vm3, %vm1548_vm2 }
0x115d   :  { %v1544_v37 = vsub.f32 1.0, %v1543_v4 }
0x115f   :  { %v1545_v8 = vmul.f32 %v2095_v36, %v1544_v37 }
0x1161   :  { %v1546_v9 = vadd.f32 %v2095_v36, %v1545_v8 }
0x1163   :  { %v1550_v51 = vsel %vm1549_vm4, %v2095_v36, %v1546_v9 }
0x1164   :  { %v1555_v12 = vsel %vm1552_vm7, %v1554_v10, %v1550_v51 }
0x1165   :  { %v1556_v13 = vmul.f32 %v2091_v50, %v1555_v12  ;;  %v1557_v14 = vmul.f32 %v2093_v11, %v1555_v12 }
0x1167   :  { %1910 = vmatmul.msk.f32.vlgmr.msra.gmra.mxu0 %vm371_vm10, %v1556_v13  ;;  %v1590_v15 = vsel %vm371_vm10, %v1557_v14, 0.0  ;;  %v1587_v16 = vsel %vm371_vm10, %v1556_v13, 0.0 }
0x1168   :  { %1591 = vadd.xlane.f32.xlu2 %v1590_v15  ;;  %1588 = vadd.xlane.f32.xlu1 %v1587_v16 }
0x116f   :  { %1911 = vmatmul.msk.f32.gmra.mxu0 %vm371_vm10, %v1557_v14 }
0x11db   :  { %v1589_v18 = vpop.xlane.xlu1 %1588  ;;  %v1592_v19 = vpop.xlane.xlu2 %1591 }
0x11dc   :  { %2096 = vrcp.f32 %v1589_v18 }
0x11dd   :  { %2098 = vrcp.f32 %v1592_v19 }
0x11e2   :  { %v2097_v33 = vpop.eup %2096 }
0x11e3   :  { %v2099_v23 = vpop.eup %2098 }
0x11e4   :  { %v1581_v21 = vpop.f32.mrf.mxu0 }
0x11e5   :  { %v1595_v22 = vmul.f32 %v2097_v33, %v1581_v21 }
0x11e7   :  { %v1597_v20 = vmul.f32 %v1595_v22, %v1595_v22 }
0x11e9   :  { %v1599_v27 = vsel %vm31_vm0, %v1597_v20, 0.0 }
0x11ea   :  { %1600 = vadd.xlane.f32.xlu0 %v1599_v27 }
0x11ec   :  { %v1584_v1 = vpop.f32.mrf.mxu0 }
0x11ed   :  { %v1596_v62 = vmul.f32 %v2099_v23, %v1584_v1 }
0x11ef   :  { %v1598_v34 = vmul.f32 %v1596_v62, %v1596_v62 }
0x11f1   :  { %v1602_v24 = vsel %vm31_vm0, %v1598_v34, 0.0 }
0x11f2   :  { %1603 = vadd.xlane.f32.xlu1 %v1602_v24 }
0x125d   :  { %v1601_v6 = vpop.xlane.xlu0 %1600 }
0x125e   :  { %2100 = vrsqrt.f32 %v1601_v6  ;;  %vm1611_vm6 = vweird.f32 %v1601_v6 }
0x1264   :  { %v2101_v17 = vpop.eup %2100 }
0x1265   :  { %v1606_v59 = vmul.f32 %v2101_v17, %v1601_v6  ;;  %v1604_v60 = vpop.xlane.xlu1 %1603  ;;  %vm1612_vm5 = vweird.f32 %v2101_v17 }
0x1266   :  { %2102 = vrsqrt.f32 %v1604_v60  ;;  %vm1613_vm8 = vmor %vm1611_vm6, %vm1612_vm5  ;;  %vm1621_vm11 = vweird.f32 %v1604_v60 }
0x1267   :  { %v1607_v26 = vmul.f32 %v2101_v17, %v1606_v59 }
0x1269   :  { %v1608_v28 = vmul.f32 0.5, %v1607_v26 }
0x126b   :  { %v1609_v42 = vsub.f32 1.5, %v1608_v28 }
0x126c   :  { %v2103_v29 = vpop.eup %2102 }
0x126d   :  { %v1610_v44 = vmul.f32 %v2101_v17, %v1609_v42  ;;  %v1616_v30 = vmul.f32 %v2103_v29, %v1604_v60  ;;  %vm1622_vm9 = vweird.f32 %v2103_v29 }
0x126e   :  { %vm1623_vm12 = vmor %vm1621_vm11, %vm1622_vm9 }
0x126f   :  { %v1614_v61 = vsel %vm1613_vm8, %v2101_v17, %v1610_v44  ;;  %v1617_v35 = vmul.f32 %v2103_v29, %v1616_v30 }
0x1270   :  { %v1625_v38 = vmul.f32 30.0, %v1614_v61 }
0x1271   :  { %v1618_v32 = vmul.f32 0.5, %v1617_v35 }
0x1272   :  { %v1627_v57 = vmul.f32 %v1625_v38, %v1595_v22 }
0x1273   :  { %v1619_v46 = vsub.f32 1.5, %v1618_v32 }
0x1274   :  { %1920 = vmatmul.msk.f32.vlgmr.msrb.gmra.mxu1 %vm31_vm0, %v1627_v57 }
0x1275   :  { %v1620_v39 = vmul.f32 %v2103_v29, %v1619_v46 }
0x1277   :  { %v1624_v40 = vsel %vm1623_vm12, %v2103_v29, %v1620_v39 }
0x1278   :  { %v1626_v7 = vmul.f32 30.0, %v1624_v40 }
0x127a   :  { %v1628_v0 = vmul.f32 %v1626_v7, %v1596_v62 }
0x127c   :  { %1921 = vmatmul.msk.f32.gmra.mxu1 %vm31_vm0, %v1628_v0 }
0x12f1   :  { %v1652_v2 = vpop.f32.mrf.mxu1 }
0x12f2   :  { %v1658_v43 = vmul.f32 1.442695, %v1652_v2 }
0x12f4   :  { %2104 = vpow2.f32 %v1658_v43 }
0x12f9   :  { %v1655_v41 = vpop.f32.mrf.mxu1 }
0x12fa   :  { %v1660_v45 = vmul.f32 1.442695, %v1655_v41  ;;  %v2105_v25 = vpop.eup %2104 }
0x12fb   :  { %v1662_v49 = vsel %vm371_vm10, %v2105_v25, 0.0 }
0x12fc   :  { %2106 = vpow2.f32 %v1660_v45 }
0x1302   :  { %v2107_v48 = vpop.eup %2106 }
0x1303   :  { %v1663_v50 = vsel %vm371_vm10, %v2107_v48, 0.0 }
0x1304   :  { %v1664_v11 = vadd.f32 %v1663_v50, %v1662_v49 }
0x1306   :  { %v1665_v47 = vrot.slane %v1664_v11, 4 }
0x1308   :  { %v1666_v52 = vadd.f32 %v1665_v47, %v1664_v11 }
0x130a   :  { %v1667_v53 = vrot.slane %v1666_v52, 2 }
0x130c   :  { %v1668_v54 = vadd.f32 %v1667_v53, %v1666_v52 }
0x130e   :  { %v1669_v55 = vrot.slane %v1668_v54, 1 }
0x1310   :  { %v1670_v56 = vadd.f32 %v1669_v55, %v1668_v54 }
0x1312   :  { %2108 = vrcp.f32 %v1670_v56  ;;  %v1682_v36 = vand.u32 2147483648, %v1670_v56  ;;  %v1680_v37 = vand.u32 2147483647, %v1670_v56  ;;  %vm1676_vm14 = vweird.f32 %v1670_v56 }
0x1314   :  { %v1683_v8 = vor.u32 1.1754944e-38, %v1682_v36  ;;  %vm1681_vm1 = vcmp.eq.f32.partialorder %v1680_v37, 8.507059e+37 }
0x1318   :  { %v2109_v58 = vpop.eup %2108 }
0x1319   :  { %v1672_v63 = vmul.f32 %v2109_v58, %v1670_v56  ;;  %vm1677_vm13 = vweird.f32 %v2109_v58 }
0x131a   :  { %vm1678_vm15 = vmor %vm1676_vm14, %vm1677_vm13 }
0x131b   :  { %v1673_v3 = vsub.f32 1.0, %v1672_v63 }
0x131d   :  { %v1674_v4 = vmul.f32 %v2109_v58, %v1673_v3 }
0x131f   :  { %v1675_v5 = vadd.f32 %v2109_v58, %v1674_v4 }
0x1321   :  { %v1679_v31 = vsel %vm1678_vm15, %v2109_v58, %v1675_v5 }
0x1322   :  { %v1684_v9 = vsel %vm1681_vm1, %v1683_v8, %v1679_v31 }
0x1323   :  { %v1685_v10 = vmul.f32 %v2105_v25, %v1684_v9  ;;  %v1686_v51 = vmul.f32 %v2107_v48, %v1684_v9 }
0x1325   :  { %1922 = vmatmul.msk.f32.vlgmr.msrb.gmra.mxu3 %vm371_vm10, %v1685_v10  ;;  %1722 = vst.msk [vmem:[#allocation4] sm:$0xff] %vm371_vm10, %v1685_v10  ;;  %v1719_v12 = vsel %vm371_vm10, %v1686_v51, 0.0  ;;  %v1716_v13 = vsel %vm371_vm10, %v1685_v10, 0.0 }
0x1326   :  { %1723 = vst.msk [vmem:[#allocation4 + $0x8] sm:$0xff] %vm371_vm10, %v1686_v51  ;;  %1720 = vadd.xlane.f32.xlu0 %v1719_v12  ;;  %1717 = vadd.xlane.f32.xlu2 %v1716_v13 }
0x1327   :  { %1781 = dma.vmem_to_hbm [thread:$0]  %s1774_s4, 256, %s1776_s7, [#allocation5], %s2167_s8, %s2167_s8, %s2168_s9  }
0x132d   :  { %1923 = vmatmul.msk.f32.gmra.mxu3 %vm371_vm10, %v1686_v51 }
0x1399   :  { %v1721_v14 = vpop.xlane.xlu0 %1720  ;;  %v1718_v15 = vpop.xlane.xlu2 %1717 }
0x139a   :  { %2110 = vrcp.f32 %v1721_v14  ;;  %v1735_v27 = vand.u32 2147483648, %v1718_v15  ;;  %v1733_v1 = vand.u32 2147483647, %v1718_v15  ;;  %vm1729_vm2 = vweird.f32 %v1718_v15 }
0x139b   :  { %2112 = vrcp.f32 %v1718_v15  ;;  %v1749_v17 = vand.u32 2147483648, %v1721_v14  ;;  %vm1743_vm5 = vweird.f32 %v1721_v14  ;;  %v1747_v26 = vand.u32 2147483647, %v1721_v14 }
0x139c   :  { %v1736_v24 = vor.u32 1.1754944e-38, %v1735_v27  ;;  %vm1734_vm7 = vcmp.eq.f32.partialorder %v1733_v1, 8.507059e+37 }
0x139d   :  { %v1750_v29 = vor.u32 1.1754944e-38, %v1749_v17  ;;  %vm1748_vm8 = vcmp.eq.f32.partialorder %v1747_v26, 8.507059e+37 }
0x13a0   :  { %v2111_v16 = vpop.eup %2110 }
0x13a1   :  { %v2113_v18 = vpop.eup %2112  ;;  %v1739_v19 = vmul.f32 %v2111_v16, %v1721_v14  ;;  %vm1744_vm4 = vweird.f32 %v2111_v16 }
0x13a2   :  { %v1725_v33 = vmul.f32 %v2113_v18, %v1718_v15  ;;  %vm1730_vm10 = vweird.f32 %v2113_v18  ;;  %vm1745_vm6 = vmor %vm1743_vm5, %vm1744_vm4 }
0x13a3   :  { %v1740_v21 = vsub.f32 1.0, %v1739_v19  ;;  %vm1731_vm3 = vmor %vm1729_vm2, %vm1730_vm10 }
0x13a4   :  { %v1726_v22 = vsub.f32 1.0, %v1725_v33 }
0x13a5   :  { %v1741_v20 = vmul.f32 %v2111_v16, %v1740_v21 }
0x13a6   :  { %v1727_v23 = vmul.f32 %v2113_v18, %v1726_v22 }
0x13a7   :  { %v1742_v6 = vadd.f32 %v2111_v16, %v1741_v20 }
0x13a8   :  { %v1710_v62 = vpop.f32.mrf.mxu3  ;;  %v1728_v34 = vadd.f32 %v2113_v18, %v1727_v23 }
0x13a9   :  { %v1746_v42 = vsel %vm1745_vm6, %v2111_v16, %v1742_v6 }
0x13aa   :  { %v1732_v59 = vsel %vm1731_vm3, %v2113_v18, %v1728_v34  ;;  %v1751_v30 = vsel %vm1748_vm8, %v1750_v29, %v1746_v42 }
0x13ab   :  { %v1737_v60 = vsel %vm1734_vm7, %v1736_v24, %v1732_v59 }
0x13ac   :  { %v1752_v28 = vmul.f32 %v1737_v60, %v1710_v62 }
0x13ae   :  { %1754 = vst.msk [vmem:[#allocation2] sm:$0xff] %vm31_vm0, %v1752_v28 }
0x13b0   :  { %v1713_v44 = vpop.f32.mrf.mxu3 }
0x13b1   :  { %v1753_v61 = vmul.f32 %v1751_v30, %v1713_v44 }
0x13b3   :  { %1755 = vst.msk [vmem:[#allocation2 + $0x8] sm:$0xff] %vm31_vm0, %v1753_v61 }
0x13b4   :  { %1768 = dma.vmem_to_hbm [thread:$0]  %s1761_s10, 256, %s1763_s13, [#allocation3], %s2167_s8, %s2167_s8, %s2168_s9  }
0x13b5   :  { %2162 = dma.done.wait [#allocation3], 256  }
0x13b6   :  { %2163 = vsyncadd [#allocation3], 4294967040 }
0x13b7   :  { %2164 = dma.done.wait [#allocation5], 256  }
0x13b8   :  { %2165 = vsyncadd [#allocation5], 4294967040 }
0x13b9   :  { %1790 = vsyncpa [#allocation3], 1 }
0x13ba   :  { %1791 = vsyncpa [#allocation5], 1 }

</bundles_post_ra>
